<compile_context>
chip_gen: v7x
topology: tpu7x:2x2x1
jax: 0.10.0
libtpu: 0.0.40
codegen_flags: <defaults>
</compile_context>

<pallas_src>
import math

import jax
import jax.numpy as jnp
from jax.experimental import pallas as pl
from jax.experimental.pallas import tpu as pltpu

# Module hyper-parameters (from mdg_FeedForwardNet.__init__)
COLORS = 4
IMG_W = 25
IMG_H = 25
IMG_SIZE = COLORS * IMG_W * IMG_H          # 2500 (K of the first GEMM, unpadded)
HIDDEN = 256
NUM_CLASSES = 5
OUT_PAD = 128                              # lane-dense logits / output width
NEG_INF = -1e30                            # padded-class logit bias -> exp() == 0

MAX_TILE_B = 1024                          # f32 x tile ~10 MiB; 2x-buffered ~20 MiB


def _round_up(x, m):
    return (x + m - 1) // m * m


def _choose_tile_b(batch):
    """Largest tile (<= MAX_TILE_B, multiple of 16) whose batch-padding waste
    stays under ~12.5% of the real batch."""
    tile_b = min(MAX_TILE_B, _round_up(batch, 16))
    while tile_b > 16 and (_round_up(batch, tile_b) - batch) * 8 > batch:
        tile_b = max(16, _round_up(tile_b // 2, 16))
    return tile_b


def ffn_kernel(x_ref, w1_ref, b1_ref, w2_ref, b2_ref, o_ref):
    """One batch tile of: Linear -> ReLU -> Linear -> Softmax.

    x_ref : (TILE_B, 2500)     f32   raw flattened image rows
    w1_ref: (2500, HIDDEN)     bf16  resident
    b1_ref: (1, HIDDEN)        f32   resident
    w2_ref: (HIDDEN, OUT_PAD)  bf16  resident (zero-padded class columns)
    b2_ref: (1, OUT_PAD)       f32   resident (NEG_INF in padded class lanes)
    o_ref : (TILE_B, OUT_PAD)  bf16  softmax probs; real classes in lanes 0..4
    """
    # In-kernel bf16 cast (VPU) -- hidden under the x DMA; keeps HBM traffic at
    # one f32 read of x instead of a separate XLA pad/cast pass.
    xb = x_ref[...].astype(jnp.bfloat16)

    # Linear 1: bf16 MXU matmul, f32 accumulation; bias + ReLU in f32 (VPU).
    h = jnp.dot(xb, w1_ref[...], preferred_element_type=jnp.float32)
    h = jnp.maximum(h + b1_ref[...], 0.0)

    # Linear 2: tiny GEMM padded to one full 128-lane MXU tile.
    logits = jnp.dot(h.astype(jnp.bfloat16), w2_ref[...],
                     preferred_element_type=jnp.float32) + b2_ref[...]

    # Numerically stable softmax over the 128-wide (padded) class axis.
    # Padded lanes have logits ~ -1e30 -> exp underflows to exactly 0.
    m = jnp.max(logits, axis=-1, keepdims=True)
    e = jnp.exp(logits - m)
    denom = jnp.sum(e, axis=-1, keepdims=True)
    # Exact division: restores rows summing to 1 at f32 precision (the approx
    # EUP reciprocal saved nothing here and failed the normalization check).
    o_ref[...] = (e / denom).astype(o_ref.dtype)


def init_params(key):
    """torch.nn.Linear default init: U(-1/sqrt(fan_in), 1/sqrt(fan_in)).
    Weights stored (in, out) so the kernel computes x @ W directly."""
    k1, k2, k3, k4 = jax.random.split(key, 4)
    bound1 = 1.0 / math.sqrt(IMG_SIZE)
    bound2 = 1.0 / math.sqrt(HIDDEN)
    w1 = jax.random.uniform(k1, (IMG_SIZE, HIDDEN), jnp.float32, -bound1, bound1)
    b1 = jax.random.uniform(k2, (HIDDEN,), jnp.float32, -bound1, bound1)
    w2 = jax.random.uniform(k3, (HIDDEN, NUM_CLASSES), jnp.float32, -bound2, bound2)
    b2 = jax.random.uniform(k4, (NUM_CLASSES,), jnp.float32, -bound2, bound2)
    return w1, b1, w2, b2


def prepare_params(w1, b1, w2, b2):
    """One-time weight prep (weight-stationary across calls): bf16 matmul
    operands, lane-dense class padding, NEG_INF bias in padded class lanes."""
    w1p = w1.astype(jnp.bfloat16)                                    # (2500, 256)
    b1p = b1.reshape(1, HIDDEN).astype(jnp.float32)                  # (1, 256)
    w2p = jnp.pad(w2, ((0, 0), (0, OUT_PAD - NUM_CLASSES))).astype(jnp.bfloat16)
    b2p = jnp.pad(b2.reshape(1, NUM_CLASSES),
                  ((0, 0), (0, OUT_PAD - NUM_CLASSES)),
                  constant_values=NEG_INF).astype(jnp.float32)       # (1, 128)
    return w1p, b1p, w2p, b2p


@jax.jit
def feed_forward_net(x_nchw, w1p, b1p, w2p, b2p):
    """Forward pass of mdg_FeedForwardNet. x_nchw: (B, 4, 25, 25) float32."""
    B = x_nchw.shape[0]
    # nn.Flatten(): (B, C, H, W) -> (B, C*H*W), row-major. Free metadata reshape.
    x_flat = x_nchw.reshape(B, IMG_SIZE)

    tile_b = _choose_tile_b(B)
    b_pad = _round_up(B, tile_b)
    if b_pad != B:                         # pad batch only when tile doesn't divide
        x_flat = jnp.pad(x_flat, ((0, b_pad - B), (0, 0)))

    probs = pl.pallas_call(
        ffn_kernel,
        out_shape=jax.ShapeDtypeStruct((b_pad, OUT_PAD), jnp.bfloat16),
        grid=(b_pad // tile_b,),
        in_specs=[
            # x: streamed per batch tile (f32; cast to bf16 inside the kernel).
            pl.BlockSpec((tile_b, IMG_SIZE), lambda i: (i, 0)),
            # Weights / biases: constant index_map -> resident in VMEM.
            pl.BlockSpec((IMG_SIZE, HIDDEN), lambda i: (0, 0)),
            pl.BlockSpec((1, HIDDEN), lambda i: (0, 0)),
            pl.BlockSpec((HIDDEN, OUT_PAD), lambda i: (0, 0)),
            pl.BlockSpec((1, OUT_PAD), lambda i: (0, 0)),
        ],
        out_specs=pl.BlockSpec((tile_b, OUT_PAD), lambda i: (i, 0)),
        compiler_params=pltpu.CompilerParams(
            dimension_semantics=("parallel",),   # v7x: shard batch tiles over 2 TCs
            vmem_limit_bytes=48 << 20,           # ~30 MiB working set at tile_b=1024
        ),
    )(x_flat, w1p, b1p, w2p, b2p)

    # Drop batch padding and the padded class lanes; return f32 like the module.
    return probs[:B, :NUM_CLASSES].astype(jnp.float32)


def reference_forward(x_nchw, w1, b1, w2, b2):
    """Pure-JAX f32 reference of the PyTorch module's forward."""
    x = x_nchw.reshape(x_nchw.shape[0], IMG_SIZE)
    h = jnp.maximum(x @ w1 + b1, 0.0)
    logits = h @ w2 + b2
    return jax.nn.softmax(logits, axis=-1)


if __name__ == "__main__":
    key = jax.random.PRNGKey(0)
    kx, kp = jax.random.split(key)

    batch = 2
    x = jax.random.normal(kx, (batch, COLORS, IMG_W, IMG_H), jnp.float32)
    w1, b1, w2, b2 = init_params(kp)
    w1p, b1p, w2p, b2p = prepare_params(w1, b1, w2, b2)

    preds = feed_forward_net(x, w1p, b1p, w2p, b2p)
    jax.block_until_ready(preds)

    # Sanity checks: shape; rows sum to 1 (exact-division softmax, bf16 output
    # rounding contributes <~2e-3); agreement with the f32 reference (bf16
    # matmul operands -> loose atol).
    assert preds.shape == (batch, NUM_CLASSES)
    row_sums = jnp.sum(preds, axis=1)
    assert bool(jnp.allclose(row_sums, 1.0, atol=1e-2)), row_sums
    ref = reference_forward(x, w1, b1, w2, b2)
    assert bool(jnp.max(jnp.abs(preds - ref)) < 5e-2)

    print("KERNEL_OK")
</pallas_src>

<mosaic_0001>
module attributes {stable_mosaic.version = 11 : i64} {
  func.func @ffn_kernel(%arg0: i32, %arg1: memref<16x2500xf32, #tpu.memory_space<vmem>>, %arg2: memref<2500x256xbf16, #tpu.memory_space<vmem>>, %arg3: memref<1x256xf32, #tpu.memory_space<vmem>>, %arg4: memref<256x128xbf16, #tpu.memory_space<vmem>>, %arg5: memref<1x128xf32, #tpu.memory_space<vmem>>, %arg6: memref<16x128xbf16, #tpu.memory_space<vmem>>) attributes {dimension_semantics = [#tpu.dimension_semantics<parallel>], iteration_bounds = array<i64: 1>, scalar_prefetch = 0 : i64, scratch_operands = 0 : i64, tpu.core_type = #tpu.core_type<tc>, window_params = [{transform_indices = @transform_0, window_bounds = array<i64: 16, 2500>}, {pipeline_mode = #tpu.pipeline_mode<synchronous>, transform_indices = @transform_1, window_bounds = array<i64: 2500, 256>}, {pipeline_mode = #tpu.pipeline_mode<synchronous>, transform_indices = @transform_2, window_bounds = array<i64: 1, 256>}, {pipeline_mode = #tpu.pipeline_mode<synchronous>, transform_indices = @transform_3, window_bounds = array<i64: 256, 128>}, {pipeline_mode = #tpu.pipeline_mode<synchronous>, transform_indices = @transform_4, window_bounds = array<i64: 1, 128>}, {transform_indices = @transform_5, window_bounds = array<i64: 16, 128>}]} {
    %c0 = arith.constant 0 : index
    %c0_0 = arith.constant 0 : index
    %0 = vector.load %arg1[%c0, %c0_0] : memref<16x2500xf32, #tpu.memory_space<vmem>>, vector<16x2500xf32>
    %1 = arith.truncf %0 : vector<16x2500xf32> to vector<16x2500xbf16>
    %c0_1 = arith.constant 0 : index
    %c0_2 = arith.constant 0 : index
    %2 = vector.load %arg2[%c0_1, %c0_2] : memref<2500x256xbf16, #tpu.memory_space<vmem>>, vector<2500x256xbf16>
    %cst = arith.constant dense<0.000000e+00> : vector<16x256xf32>
    %3 = tpu.matmul %1, %2, %cst {dimension_numbers = #tpu.dot_dimension_numbers<[1], [0], [0], [1], [0, 0, 1, 1], [], []>} : vector<16x2500xbf16>, vector<2500x256xbf16>, vector<16x256xf32> -> vector<16x256xf32>
    %c0_3 = arith.constant 0 : index
    %c0_4 = arith.constant 0 : index
    %4 = vector.load %arg3[%c0_3, %c0_4] : memref<1x256xf32, #tpu.memory_space<vmem>>, vector<1x256xf32>
    %5 = vector.broadcast %4 : vector<1x256xf32> to vector<16x256xf32>
    %6 = arith.addf %3, %5 : vector<16x256xf32>
    %cst_5 = arith.constant 0.000000e+00 : f32
    %7 = vector.broadcast %cst_5 : f32 to vector<16x256xf32>
    %8 = arith.maximumf %6, %7 : vector<16x256xf32>
    %9 = arith.truncf %8 : vector<16x256xf32> to vector<16x256xbf16>
    %c0_6 = arith.constant 0 : index
    %c0_7 = arith.constant 0 : index
    %10 = vector.load %arg4[%c0_6, %c0_7] : memref<256x128xbf16, #tpu.memory_space<vmem>>, vector<256x128xbf16>
    %cst_8 = arith.constant dense<0.000000e+00> : vector<16x128xf32>
    %11 = tpu.matmul %9, %10, %cst_8 {dimension_numbers = #tpu.dot_dimension_numbers<[1], [0], [0], [1], [0, 0, 1, 1], [], []>} : vector<16x256xbf16>, vector<256x128xbf16>, vector<16x128xf32> -> vector<16x128xf32>
    %c0_9 = arith.constant 0 : index
    %c0_10 = arith.constant 0 : index
    %12 = vector.load %arg5[%c0_9, %c0_10] : memref<1x128xf32, #tpu.memory_space<vmem>>, vector<1x128xf32>
    %13 = vector.broadcast %12 : vector<1x128xf32> to vector<16x128xf32>
    %14 = arith.addf %11, %13 : vector<16x128xf32>
    %cst_11 = arith.constant dense<0xFF800000> : vector<16xf32>
    %15 = vector.multi_reduction <maximumf>, %14, %cst_11 [1] : vector<16x128xf32> to vector<16xf32>
    %16 = vector.shape_cast %15 : vector<16xf32> to vector<16x1xf32>
    %17 = vector.broadcast %16 : vector<16x1xf32> to vector<16x128xf32>
    %18 = arith.subf %14, %17 : vector<16x128xf32>
    %19 = math.exp %18 : vector<16x128xf32>
    %cst_12 = arith.constant dense<0.000000e+00> : vector<16xf32>
    %20 = vector.multi_reduction <add>, %19, %cst_12 [1] : vector<16x128xf32> to vector<16xf32>
    %21 = vector.shape_cast %20 : vector<16xf32> to vector<16x1xf32>
    %22 = vector.broadcast %21 : vector<16x1xf32> to vector<16x128xf32>
    %23 = arith.divf %19, %22 : vector<16x128xf32>
    %24 = arith.truncf %23 : vector<16x128xf32> to vector<16x128xbf16>
    %c0_13 = arith.constant 0 : index
    %c0_14 = arith.constant 0 : index
    %25 = vector.load %arg6[%c0_13, %c0_14] : memref<16x128xbf16, #tpu.memory_space<vmem>>, vector<16x128xbf16>
    tpu.vector_store %arg6[%c0_13, %c0_14], %24 {strides = array<i32>} : memref<16x128xbf16, #tpu.memory_space<vmem>>, vector<16x128xbf16>,
    return
  }
  func.func @transform_0(%arg0: i32) -> (i32, i32) {
    %c0_i32 = arith.constant 0 : i32
    %c0_i32_0 = arith.constant 0 : i32
    return %arg0, %c0_i32 : i32, i32
  }
  func.func @transform_1(%arg0: i32) -> (i32, i32) {
    %c0_i32 = arith.constant 0 : i32
    %c0_i32_0 = arith.constant 0 : i32
    %c0_i32_1 = arith.constant 0 : i32
    return %c0_i32, %c0_i32_0 : i32, i32
  }
  func.func @transform_2(%arg0: i32) -> (i32, i32) {
    %c0_i32 = arith.constant 0 : i32
    %c0_i32_0 = arith.constant 0 : i32
    %c0_i32_1 = arith.constant 0 : i32
    return %c0_i32, %c0_i32_0 : i32, i32
  }
  func.func @transform_3(%arg0: i32) -> (i32, i32) {
    %c0_i32 = arith.constant 0 : i32
    %c0_i32_0 = arith.constant 0 : i32
    %c0_i32_1 = arith.constant 0 : i32
    return %c0_i32, %c0_i32_0 : i32, i32
  }
  func.func @transform_4(%arg0: i32) -> (i32, i32) {
    %c0_i32 = arith.constant 0 : i32
    %c0_i32_0 = arith.constant 0 : i32
    %c0_i32_1 = arith.constant 0 : i32
    return %c0_i32, %c0_i32_0 : i32, i32
  }
  func.func @transform_5(%arg0: i32) -> (i32, i32) {
    %c0_i32 = arith.constant 0 : i32
    %c0_i32_0 = arith.constant 0 : i32
    return %arg0, %c0_i32 : i32, i32
  }
}

</mosaic_0001>

<bundles_post_ra>
// kernel: feed_forward_net.1
= control target key start
LH: loop header
LB: loop body
LE: loop exit
PB: predicated region body
PF: predicated region fallthrough
CT: control target
= control target key end

     0   :  { %10 = vsyncpa [#allocation3], 0  ;;  %s3896_s0 = inlined_call_operand.vmem [shape: f32[16,2500], index: 0, kind: input, shape index: {}]   ;;  %s3897_s1 = inlined_call_operand.hbm [shape: bf16[2500,256], index: 1, kind: input, shape index: {}]   ;;  %s3898_s2 = inlined_call_operand.hbm [shape: f32[1,256], index: 2, kind: input, shape index: {}]   ;;  %s3899_s3 = inlined_call_operand.hbm [shape: bf16[256,128], index: 3, kind: input, shape index: {}]   ;;  %s3900_s4 = inlined_call_operand.hbm [shape: f32[1,128], index: 4, kind: input, shape index: {}]   ;;  %s3901_s5 = inlined_call_operand.vmem [shape: bf16[16,128], index: 5, kind: output, shape index: {}]  }
   0x1   :  { %11 = vsyncpa [#allocation5], 0 }
   0x2   :  { %12 = vsyncpa [#allocation8], 0  ;;  %s3680_s18 = smov [#allocation4]   ;;  %s3681_s20 = smov [#allocation2]  }
   0x3   :  { %s33_s19 = sshll.u32 %s3680_s18, 4  ;;  %s20_s21 = sshll.u32 %s3681_s20, 4  ;;  %s34_s19 = int_to_ptr.vmem [resolvable:$true] %s33_s19  ;;  %s3718_s21 = int_to_ptr.vmem [resolvable:$true] %s20_s21 }
   0x4   :  { %s3586_s24 = scalar_lea.hbm %s3898_s2, 32 }
   0x5   :  { %p3587_p0 = scmp.ne.s32.totalorder %s3898_s2, %s3586_s24  ;;  %p3590_p1 = scmp.lt.u32.totalorder %s3586_s24, %s3898_s2 }
   0x7   :  { %p3592_p2 = pnand %p3590_p1, %p3587_p0 }
   0x9   :  { %3595 = shalt.err (!%p3592_p2)
}
   0xa   :  { %s3596_s29 = scalar_lea.vmem %s34_s19, 32  ;;  %p3601_p4 = scmp.lt.s32.totalorder %s34_s19, %s34_s19 }
   0xb   :  { %p3597_p3 = scmp.ne.s32.totalorder %s34_s19, %s3596_s29  ;;  %p3602_p5 = scmp.lt.s32.totalorder %s3596_s29, %s3596_s29 }
   0xd   :  { %p3603_p6 = por %p3602_p5, %p3601_p4 }
   0xf   :  { %p3604_p7 = pnand %p3603_p6, %p3597_p3 }
  0x11   :  { %3607 = shalt.err (!%p3604_p7)
}
  0x12   :  { %36 = dma.hbm_to_vmem [thread:$0]  %s3898_s2, 32, %s34_s19, [#allocation5]  }
  0x13   :  { %s3608_s9 = scalar_lea.hbm %s3897_s1, 40064 }
  0x14   :  { %p3609_p8 = scmp.ne.s32.totalorder %s3897_s1, %s3608_s9  ;;  %p3612_p9 = scmp.lt.u32.totalorder %s3608_s9, %s3897_s1 }
  0x16   :  { %p3614_p10 = pnand %p3612_p9, %p3609_p8 }
  0x18   :  { %3617 = shalt.err (!%p3614_p10)
}
  0x19   :  { %s3618_s14 = scalar_lea.vmem %s3718_s21, 40064  ;;  %p3623_p12 = scmp.lt.s32.totalorder %s3718_s21, %s3718_s21 }
  0x1a   :  { %p3619_p11 = scmp.ne.s32.totalorder %s3718_s21, %s3618_s14  ;;  %p3624_p13 = scmp.lt.s32.totalorder %s3618_s14, %s3618_s14 }
  0x1c   :  { %p3625_p0 = por %p3624_p13, %p3623_p12 }
  0x1e   :  { %p3626_p1 = pnand %p3625_p0, %p3619_p11 }
  0x20   :  { %3629 = shalt.err (!%p3626_p1)
}
  0x21   :  { %s3682_s2 = smov 128   ;;  %s3683_s15 = smov 8  }
  0x22   :  { %26 = dma.hbm_to_vmem [thread:$0]  %s3897_s1, 40064, %s3718_s21, [#allocation3], %s3682_s2, %s3682_s2, %s3683_s15  }
  0x23   :  { %s3684_s18 = smov [#allocation6]   ;;  %s3630_s23 = scalar_lea.hbm %s3899_s3, 2048 }
  0x24   :  { %s42_s19 = sshll.u32 %s3684_s18, 4  ;;  %p3631_p2 = scmp.ne.s32.totalorder %s3899_s3, %s3630_s23  ;;  %s43_s19 = int_to_ptr.vmem [resolvable:$true] %s42_s19 }
  0x25   :  { %p3634_p3 = scmp.lt.u32.totalorder %s3630_s23, %s3899_s3 }
  0x27   :  { %p3636_p4 = pnand %p3634_p3, %p3631_p2 }
  0x29   :  { %3639 = shalt.err (!%p3636_p4)
}
  0x2a   :  { %s3640_s28 = scalar_lea.vmem %s43_s19, 2048  ;;  %p3645_p6 = scmp.lt.s32.totalorder %s43_s19, %s43_s19 }
  0x2b   :  { %p3641_p5 = scmp.ne.s32.totalorder %s43_s19, %s3640_s28  ;;  %p3646_p7 = scmp.lt.s32.totalorder %s3640_s28, %s3640_s28 }
  0x2d   :  { %p3647_p8 = por %p3646_p7, %p3645_p6 }
  0x2f   :  { %p3648_p9 = pnand %p3647_p8, %p3641_p5 }
  0x31   :  { %3651 = shalt.err (!%p3648_p9)
}
  0x32   :  { %s3685_s1 = smov 64   ;;  %s3686_s21 = smov 4  }
  0x33   :  { %48 = dma.hbm_to_vmem [thread:$0]  %s3899_s3, 2048, %s43_s19, [#allocation5], %s3685_s1, %s3685_s1, %s3686_s21  }
  0x34   :  { %s3687_s6 = smov [#allocation7]   ;;  %s3652_s10 = scalar_lea.hbm %s3900_s4, 16 }
  0x35   :  { %s55_s7 = sshll.u32 %s3687_s6, 4  ;;  %p3653_p10 = scmp.ne.s32.totalorder %s3900_s4, %s3652_s10  ;;  %s56_s7 = int_to_ptr.vmem [resolvable:$true] %s55_s7 }
  0x36   :  { %p3656_p11 = scmp.lt.u32.totalorder %s3652_s10, %s3900_s4 }
  0x38   :  { %p3658_p12 = pnand %p3656_p11, %p3653_p10 }
  0x3a   :  { %3661 = shalt.err (!%p3658_p12)
}
  0x3b   :  { %s3662_s2 = scalar_lea.vmem %s56_s7, 16  ;;  %s3666_s3 = scalar_lea.vmem %s56_s7, 32 }
  0x3c   :  { %p3663_p13 = scmp.ne.s32.totalorder %s56_s7, %s3662_s2  ;;  %p3667_p0 = scmp.lt.s32.totalorder %s56_s7, %s56_s7 }
  0x3d   :  { %p3668_p1 = scmp.lt.s32.totalorder %s3666_s3, %s3662_s2 }
  0x3f   :  { %p3669_p2 = por %p3668_p1, %p3667_p0 }
  0x41   :  { %p3670_p3 = pnand %p3669_p2, %p3663_p13 }
  0x43   :  { %3673 = shalt.err (!%p3670_p3)
}
  0x44   :  { %58 = dma.hbm_to_vmem [thread:$0]  %s3900_s4, 16, %s56_s7, [#allocation8]  }
  0x45   :  { %3674 = dma.done.wait [#allocation3], 40064  }
  0x46   :  { %3675 = vsyncadd [#allocation3], 4294927232 }
  0x47   :  { %3676 = dma.done.wait [#allocation5], 2080  }
  0x48   :  { %3677 = vsyncadd [#allocation5], 4294965216 }
  0x49   :  { %3678 = dma.done.wait [#allocation8], 16  }
  0x4a   :  { %3679 = vsyncadd [#allocation8], 4294967280  ;;  %v3092_v0 = vld [vmem:[#allocation2 + $0x4] ss:$8 sps:$4 sm:$0xff]   ;;  %v3096_v2 = vld [vmem:[#allocation2] ss:$8 sps:$4 sm:$0xff]  }
  0x4b   :  { %v3094_v1 = vld [vmem:[#allocation2 + $0x404] ss:$8 sps:$4 sm:$0xff]   ;;  %2033 = vmatprep.subr.bf16.mxu1 %v3092_v0  ;;  %v3097_v3 = vld [vmem:[#allocation2 + $0x400] ss:$8 sps:$4 sm:$0xff]   ;;  %v3098_v4 = vld [vmem:[#allocation2 + $0x14] ss:$8 sps:$4 sm:$0xff]  }
  0x4c   :  { %2205 = vmatprep.subr.bf16.mxu0 %v3094_v1  ;;  %2034 = vmatpush1.bf16.msra.mxu1 %v3096_v2  ;;  %v3100_v5 = vld [vmem:[#allocation2 + $0x414] ss:$8 sps:$4 sm:$0xff]   ;;  %v3102_v6 = vld [vmem:[#allocation2 + $0x10] ss:$8 sps:$4 sm:$0xff]   ;;  %v3104_v8 = vld [vmem:[#allocation2 + $0x24] ss:$8 sps:$4 sm:$0xff]  }
  0x4d   :  { %2206 = vmatpush1.bf16.msra.mxu0 %v3097_v3  ;;  %2035 = vmatprep.subr.bf16.mxu1 %v3098_v4  ;;  %v3103_v7 = vld [vmem:[#allocation2 + $0x410] ss:$8 sps:$4 sm:$0xff]   ;;  %v3106_v9 = vld [vmem:[#allocation2 + $0x424] ss:$8 sps:$4 sm:$0xff]   ;;  %v3108_v10 = vld [vmem:[#allocation2 + $0x20] ss:$8 sps:$4 sm:$0xff]  }
  0x4e   :  { %2207 = vmatprep.subr.bf16.mxu0 %v3100_v5  ;;  %v3109_v11 = vld [vmem:[#allocation2 + $0x420] ss:$8 sps:$4 sm:$0xff]   ;;  %v3110_v12 = vld [vmem:[#allocation2 + $0x34] ss:$8 sps:$4 sm:$0xff]   ;;  %v3114_v14 = vld [vmem:[#allocation2 + $0x30] ss:$8 sps:$4 sm:$0xff]  }
  0x4f   :  { %v3112_v13 = vld [vmem:[#allocation2 + $0x434] ss:$8 sps:$4 sm:$0xff]   ;;  %v3115_v15 = vld [vmem:[#allocation2 + $0x430] ss:$8 sps:$4 sm:$0xff]   ;;  %v3116_v16 = vld [vmem:[#allocation2 + $0x44] ss:$8 sps:$4 sm:$0xff]  }
  0x50   :  { %2036 = vmatpush1.bf16.msra.mxu1 %v3102_v6  ;;  %v3118_v17 = vld [vmem:[#allocation2 + $0x444] ss:$8 sps:$4 sm:$0xff]   ;;  %v3120_v18 = vld [vmem:[#allocation2 + $0x40] ss:$8 sps:$4 sm:$0xff]   ;;  %v3122_v20 = vld [vmem:[#allocation2 + $0x54] ss:$8 sps:$4 sm:$0xff]  }
  0x51   :  { %2208 = vmatpush1.bf16.msra.mxu0 %v3103_v7  ;;  %2037 = vmatprep.subr.bf16.mxu1 %v3104_v8  ;;  %v3121_v19 = vld [vmem:[#allocation2 + $0x440] ss:$8 sps:$4 sm:$0xff]   ;;  %v3124_v21 = vld [vmem:[#allocation2 + $0x454] ss:$8 sps:$4 sm:$0xff]   ;;  %v3126_v22 = vld [vmem:[#allocation2 + $0x50] ss:$8 sps:$4 sm:$0xff]  }
  0x52   :  { %2209 = vmatprep.subr.bf16.mxu0 %v3106_v9  ;;  %v3127_v23 = vld [vmem:[#allocation2 + $0x450] ss:$8 sps:$4 sm:$0xff]   ;;  %v3128_v24 = vld [vmem:[#allocation2 + $0x64] ss:$8 sps:$4 sm:$0xff]   ;;  %v3132_v26 = vld [vmem:[#allocation2 + $0x60] ss:$8 sps:$4 sm:$0xff]  }
  0x53   :  { %v3130_v25 = vld [vmem:[#allocation2 + $0x464] ss:$8 sps:$4 sm:$0xff]   ;;  %v3133_v27 = vld [vmem:[#allocation2 + $0x460] ss:$8 sps:$4 sm:$0xff]   ;;  %v3134_v28 = vld [vmem:[#allocation2 + $0x74] ss:$8 sps:$4 sm:$0xff]  }
  0x54   :  { %2038 = vmatpush1.bf16.msra.mxu1 %v3108_v10  ;;  %v3136_v29 = vld [vmem:[#allocation2 + $0x474] ss:$8 sps:$4 sm:$0xff]   ;;  %v3138_v30 = vld [vmem:[#allocation2 + $0x70] ss:$8 sps:$4 sm:$0xff]   ;;  %v3140_v32 = vld [vmem:[#allocation2 + $0x84] ss:$8 sps:$4 sm:$0xff]  }
  0x55   :  { %2210 = vmatpush1.bf16.msra.mxu0 %v3109_v11  ;;  %2039 = vmatprep.subr.bf16.mxu1 %v3110_v12  ;;  %v3139_v31 = vld [vmem:[#allocation2 + $0x470] ss:$8 sps:$4 sm:$0xff]   ;;  %v3142_v33 = vld [vmem:[#allocation2 + $0x484] ss:$8 sps:$4 sm:$0xff]   ;;  %v3144_v34 = vld [vmem:[#allocation2 + $0x80] ss:$8 sps:$4 sm:$0xff]  }
  0x56   :  { %2211 = vmatprep.subr.bf16.mxu0 %v3112_v13  ;;  %v3145_v35 = vld [vmem:[#allocation2 + $0x480] ss:$8 sps:$4 sm:$0xff]   ;;  %v3146_v36 = vld [vmem:[#allocation2 + $0x94] ss:$8 sps:$4 sm:$0xff]   ;;  %v3150_v38 = vld [vmem:[#allocation2 + $0x90] ss:$8 sps:$4 sm:$0xff]  }
  0x57   :  { %v3148_v37 = vld [vmem:[#allocation2 + $0x494] ss:$8 sps:$4 sm:$0xff]   ;;  %v3151_v39 = vld [vmem:[#allocation2 + $0x490] ss:$8 sps:$4 sm:$0xff]   ;;  %v3152_v40 = vld [vmem:[#allocation2 + $0xa4] ss:$8 sps:$4 sm:$0xff]  }
  0x58   :  { %2040 = vmatpush1.bf16.msra.mxu1 %v3114_v14  ;;  %v3154_v41 = vld [vmem:[#allocation2 + $0x4a4] ss:$8 sps:$4 sm:$0xff]   ;;  %v3156_v42 = vld [vmem:[#allocation2 + $0xa0] ss:$8 sps:$4 sm:$0xff]   ;;  %v3158_v44 = vld [vmem:[#allocation2 + $0xb4] ss:$8 sps:$4 sm:$0xff]  }
  0x59   :  { %2212 = vmatpush1.bf16.msra.mxu0 %v3115_v15  ;;  %2041 = vmatprep.subr.bf16.mxu1 %v3116_v16  ;;  %v3157_v43 = vld [vmem:[#allocation2 + $0x4a0] ss:$8 sps:$4 sm:$0xff]   ;;  %v3160_v45 = vld [vmem:[#allocation2 + $0x4b4] ss:$8 sps:$4 sm:$0xff]   ;;  %v3162_v46 = vld [vmem:[#allocation2 + $0xb0] ss:$8 sps:$4 sm:$0xff]  }
  0x5a   :  { %2213 = vmatprep.subr.bf16.mxu0 %v3118_v17  ;;  %v3163_v47 = vld [vmem:[#allocation2 + $0x4b0] ss:$8 sps:$4 sm:$0xff]   ;;  %v73_v48 = vld [vmem:[%s3896_s0 + $0x8] sm:$0xff]  ;;  %v3170_v58 = vld [vmem:[#allocation2 + $0xd4] ss:$8 sps:$4 sm:$0xff]   ;;  %vm2022_vm0 = vcmask 556032  }
  0x5b   :  { %v93_v49 = vld [vmem:[%s3896_s0 + $0xa8] sm:$0xff]  ;;  %v3172_v59 = vld [vmem:[#allocation2 + $0x4d4] ss:$8 sps:$4 sm:$0xff]   ;;  %v3174_v60 = vld [vmem:[#allocation2 + $0xd0] ss:$8 sps:$4 sm:$0xff]   ;;  %vm2026_vm1 = vcmask 1041408  }
  0x5c   :  { %2042 = vmatpush1.bf16.msra.mxu1 %v3120_v18  ;;  %v3164_v50 = vld [vmem:[#allocation2 + $0xc4] ss:$8 sps:$4 sm:$0xff]   ;;  %v113_v52 = vpack.c.bf16 %v93_v49, %v73_v48  ;;  %v3168_v56 = vld [vmem:[#allocation2 + $0xc0] ss:$8 sps:$4 sm:$0xff]   ;;  %v3175_v61 = vld [vmem:[#allocation2 + $0x4d0] ss:$8 sps:$4 sm:$0xff]  }
  0x5d   :  { %2214 = vmatpush1.bf16.msra.mxu0 %v3121_v19  ;;  %2043 = vmatprep.subr.bf16.mxu1 %v3122_v20  ;;  %v3166_v51 = vld [vmem:[#allocation2 + $0x4c4] ss:$8 sps:$4 sm:$0xff]   ;;  %v3169_v57 = vld [vmem:[#allocation2 + $0x4c0] ss:$8 sps:$4 sm:$0xff]   ;;  %v3182_v2 = vld [vmem:[#allocation2 + $0xf4] ss:$8 sps:$4 sm:$0xff]  }
  0x5e   :  { %2215 = vmatprep.subr.bf16.mxu0 %v3124_v21  ;;  %v81_v53 = vld [vmem:[%s3896_s0 + $0x48] sm:$0xff]  ;;  %2065 = vmatprep.mubr.bf16.mxu1 %v113_v52  ;;  %v3184_v3 = vld [vmem:[#allocation2 + $0x4f4] ss:$8 sps:$4 sm:$0xff]   ;;  %v3186_v4 = vld [vmem:[#allocation2 + $0xf0] ss:$8 sps:$4 sm:$0xff]  }
  0x5f   :  { %v101_v54 = vld [vmem:[%s3896_s0 + $0xe8] sm:$0xff]  ;;  %v3187_v5 = vld [vmem:[#allocation2 + $0x4f0] ss:$8 sps:$4 sm:$0xff]   ;;  %v72_v6 = vld [vmem:[%s3896_s0] sm:$0xff] }
  0x60   :  { %2044 = vmatpush1.bf16.msra.mxu1 %v3126_v22  ;;  %v121_v55 = vpack.c.bf16 %v101_v54, %v81_v53  ;;  %v3176_v62 = vld [vmem:[#allocation2 + $0xe4] ss:$8 sps:$4 sm:$0xff]   ;;  %v3180_v0 = vld [vmem:[#allocation2 + $0xe0] ss:$8 sps:$4 sm:$0xff]   ;;  %v3196_v16 = vld [vmem:[#allocation2 + $0x114] ss:$8 sps:$4 sm:$0xff]  }
  0x61   :  { %2216 = vmatpush1.bf16.msra.mxu0 %v3127_v23  ;;  %2045 = vmatprep.subr.bf16.mxu1 %v3128_v24  ;;  %v3178_v63 = vld [vmem:[#allocation2 + $0x4e4] ss:$8 sps:$4 sm:$0xff]   ;;  %v3181_v1 = vld [vmem:[#allocation2 + $0x4e0] ss:$8 sps:$4 sm:$0xff]   ;;  %v3199_v17 = vld [vmem:[#allocation2 + $0x514] ss:$8 sps:$4 sm:$0xff]  }
  0x62   :  { %2217 = vmatprep.subr.bf16.mxu0 %v3130_v25  ;;  %2237 = vmatprep.mubr.bf16.mxu0 %v121_v55  ;;  %v3190_v7 = vld [vmem:[#allocation2 + $0x104] ss:$8 sps:$4 sm:$0xff]   ;;  %v3188_v12 = vld [vmem:[#allocation2 + $0x100] ss:$8 sps:$4 sm:$0xff]   ;;  %v3194_v18 = vld [vmem:[#allocation2 + $0x110] ss:$8 sps:$4 sm:$0xff]  }
  0x63   :  { %v92_v8 = vld [vmem:[%s3896_s0 + $0xa0] sm:$0xff]  ;;  %v3197_v19 = vld [vmem:[#allocation2 + $0x510] ss:$8 sps:$4 sm:$0xff]   ;;  %v3208_v24 = vld [vmem:[#allocation2 + $0x134] ss:$8 sps:$4 sm:$0xff]  }
  0x64   :  { %2046 = vmatpush1.bf16.msra.mxu1 %v3132_v26  ;;  %v80_v9 = vld [vmem:[%s3896_s0 + $0x40] sm:$0xff]  ;;  %v112_v14 = vpack.c.bf16 %v92_v8, %v72_v6  ;;  %v3211_v25 = vld [vmem:[#allocation2 + $0x534] ss:$8 sps:$4 sm:$0xff]   ;;  %v3206_v26 = vld [vmem:[#allocation2 + $0x130] ss:$8 sps:$4 sm:$0xff]  }
  0x65   :  { %2218 = vmatpush1.bf16.msra.mxu0 %v3133_v27  ;;  %2047 = vmatprep.subr.bf16.mxu1 %v3134_v28  ;;  %v100_v10 = vld [vmem:[%s3896_s0 + $0xe0] sm:$0xff]  ;;  %v3209_v27 = vld [vmem:[#allocation2 + $0x530] ss:$8 sps:$4 sm:$0xff]   ;;  %v3244_v54 = vld [vmem:[#allocation2 + $0x194] ss:$8 sps:$4 sm:$0xff]  }
  0x66   :  { %2219 = vmatprep.subr.bf16.mxu0 %v3136_v29  ;;  %v3193_v11 = vld [vmem:[#allocation2 + $0x504] ss:$8 sps:$4 sm:$0xff]   ;;  %v3191_v13 = vld [vmem:[#allocation2 + $0x500] ss:$8 sps:$4 sm:$0xff]   ;;  %v120_v15 = vpack.c.bf16 %v100_v10, %v80_v9  ;;  %v3230_v48 = vld [vmem:[#allocation2 + $0x170] ss:$8 sps:$4 sm:$0xff]  }
  0x67   :  { %v3202_v20 = vld [vmem:[#allocation2 + $0x124] ss:$8 sps:$4 sm:$0xff]   ;;  %v3200_v22 = vld [vmem:[#allocation2 + $0x120] ss:$8 sps:$4 sm:$0xff]   ;;  %v3233_v49 = vld [vmem:[#allocation2 + $0x570] ss:$8 sps:$4 sm:$0xff]  }
  0x68   :  { %2048 = vmatpush1.bf16.msra.mxu1 %v3138_v30  ;;  %v3205_v21 = vld [vmem:[#allocation2 + $0x524] ss:$8 sps:$4 sm:$0xff]   ;;  %v3203_v23 = vld [vmem:[#allocation2 + $0x520] ss:$8 sps:$4 sm:$0xff]   ;;  %v3247_v55 = vld [vmem:[#allocation2 + $0x594] ss:$8 sps:$4 sm:$0xff]  }
  0x69   :  { %2220 = vmatpush1.bf16.msra.mxu0 %v3139_v31  ;;  %2049 = vmatprep.subr.bf16.mxu1 %v3140_v32  ;;  %v3214_v28 = vld [vmem:[#allocation2 + $0x144] ss:$8 sps:$4 sm:$0xff]   ;;  %v3212_v30 = vld [vmem:[#allocation2 + $0x140] ss:$8 sps:$4 sm:$0xff]   ;;  %v3220_v32 = vld [vmem:[#allocation2 + $0x154] ss:$8 sps:$4 sm:$0xff]  }
  0x6a   :  { %2221 = vmatprep.subr.bf16.mxu0 %v3142_v33  ;;  %v3217_v29 = vld [vmem:[#allocation2 + $0x544] ss:$8 sps:$4 sm:$0xff]   ;;  %v3215_v31 = vld [vmem:[#allocation2 + $0x540] ss:$8 sps:$4 sm:$0xff]   ;;  %v3223_v33 = vld [vmem:[#allocation2 + $0x554] ss:$8 sps:$4 sm:$0xff]  }
  0x6b   :  { %v3236_v52 = vld [vmem:[#allocation2 + $0x180] ss:$8 sps:$4 sm:$0xff]   ;;  %v3268_v6 = vld [vmem:[#allocation2 + $0x1d4] ss:$8 sps:$4 sm:$0xff]   ;;  %v3266_v8 = vld [vmem:[#allocation2 + $0x1d0] ss:$8 sps:$4 sm:$0xff]  }
  0x6c   :  { %2050 = vmatpush1.bf16.msra.mxu1 %v3144_v34  ;;  %v3218_v34 = vld [vmem:[#allocation2 + $0x150] ss:$8 sps:$4 sm:$0xff]   ;;  %v3239_v53 = vld [vmem:[#allocation2 + $0x580] ss:$8 sps:$4 sm:$0xff]   ;;  %v3274_v10 = vld [vmem:[#allocation2 + $0x1e4] ss:$8 sps:$4 sm:$0xff]  }
  0x6d   :  { %2222 = vmatpush1.bf16.msra.mxu0 %v3145_v35  ;;  %2051 = vmatprep.subr.bf16.mxu1 %v3146_v36  ;;  %v3221_v35 = vld [vmem:[#allocation2 + $0x550] ss:$8 sps:$4 sm:$0xff]   ;;  %v3226_v36 = vld [vmem:[#allocation2 + $0x164] ss:$8 sps:$4 sm:$0xff]  }
  0x6e   :  { %2223 = vmatprep.subr.bf16.mxu0 %v3148_v37  ;;  %v3229_v37 = vld [vmem:[#allocation2 + $0x564] ss:$8 sps:$4 sm:$0xff]   ;;  %v3269_v9 = vld [vmem:[#allocation2 + $0x5d0] ss:$8 sps:$4 sm:$0xff]  }
  0x70   :  { %2052 = vmatpush1.bf16.msra.mxu1 %v3150_v38  ;;  %v3224_v38 = vld [vmem:[#allocation2 + $0x160] ss:$8 sps:$4 sm:$0xff]  }
  0x71   :  { %2224 = vmatpush1.bf16.msra.mxu0 %v3151_v39  ;;  %2053 = vmatprep.subr.bf16.mxu1 %v3152_v40  ;;  %v3227_v39 = vld [vmem:[#allocation2 + $0x560] ss:$8 sps:$4 sm:$0xff]   ;;  %v75_v40 = vld [vmem:[%s3896_s0 + $0x18] sm:$0xff] }
  0x72   :  { %2225 = vmatprep.subr.bf16.mxu0 %v3154_v41  ;;  %v95_v41 = vld [vmem:[%s3896_s0 + $0xb8] sm:$0xff] }
  0x74   :  { %2054 = vmatpush1.bf16.msra.mxu1 %v3156_v42  ;;  %v3232_v42 = vld [vmem:[#allocation2 + $0x174] ss:$8 sps:$4 sm:$0xff]  }
  0x75   :  { %2226 = vmatpush1.bf16.msra.mxu0 %v3157_v43  ;;  %2055 = vmatprep.subr.bf16.mxu1 %v3158_v44  ;;  %v3235_v43 = vld [vmem:[#allocation2 + $0x574] ss:$8 sps:$4 sm:$0xff]   ;;  %v115_v44 = vpack.c.bf16 %v95_v41, %v75_v40  ;;  %v3299_v40 = vld [vmem:[#allocation2 + $0x620] ss:$8 sps:$4 sm:$0xff]  }
  0x76   :  { %2227 = vmatprep.subr.bf16.mxu0 %v3160_v45  ;;  %v83_v45 = vld [vmem:[%s3896_s0 + $0x58] sm:$0xff] }
  0x78   :  { %2056 = vmatpush1.bf16.msra.mxu1 %v3162_v46  ;;  %v103_v46 = vld [vmem:[%s3896_s0 + $0xf8] sm:$0xff] }
  0x79   :  { %2228 = vmatpush1.bf16.msra.mxu0 %v3163_v47  ;;  %2057 = vmatprep.subr.bf16.mxu1 %v3164_v50  ;;  %v123_v47 = vpack.c.bf16 %v103_v46, %v83_v45  ;;  %v3238_v50 = vld [vmem:[#allocation2 + $0x184] ss:$8 sps:$4 sm:$0xff]   ;;  %v3305_v45 = vld [vmem:[#allocation2 + $0x630] ss:$8 sps:$4 sm:$0xff]  }
  0x7a   :  { %2229 = vmatprep.subr.bf16.mxu0 %v3166_v51  ;;  %v3241_v51 = vld [vmem:[#allocation2 + $0x584] ss:$8 sps:$4 sm:$0xff]  }
  0x7b   :  { %v3310_v46 = vld [vmem:[#allocation2 + $0x244] ss:$8 sps:$4 sm:$0xff]  }
  0x7c   :  { %2058 = vmatpush1.bf16.msra.mxu1 %v3168_v56  ;;  %v3242_v56 = vld [vmem:[#allocation2 + $0x190] ss:$8 sps:$4 sm:$0xff]  }
  0x7d   :  { %2230 = vmatpush1.bf16.msra.mxu0 %v3169_v57  ;;  %2059 = vmatprep.subr.bf16.mxu1 %v3170_v58  ;;  %v3245_v57 = vld [vmem:[#allocation2 + $0x590] ss:$8 sps:$4 sm:$0xff]   ;;  %v3250_v58 = vld [vmem:[#allocation2 + $0x1a4] ss:$8 sps:$4 sm:$0xff]  }
  0x7e   :  { %2231 = vmatprep.subr.bf16.mxu0 %v3172_v59  ;;  %v3253_v59 = vld [vmem:[#allocation2 + $0x5a4] ss:$8 sps:$4 sm:$0xff]  }
  0x80   :  { %2060 = vmatpush1.bf16.msra.mxu1 %v3174_v60  ;;  %v3248_v60 = vld [vmem:[#allocation2 + $0x1a0] ss:$8 sps:$4 sm:$0xff]  }
  0x81   :  { %2232 = vmatpush1.bf16.msra.mxu0 %v3175_v61  ;;  %2061 = vmatprep.subr.bf16.mxu1 %v3176_v62  ;;  %v3251_v61 = vld [vmem:[#allocation2 + $0x5a0] ss:$8 sps:$4 sm:$0xff]   ;;  %v3256_v62 = vld [vmem:[#allocation2 + $0x1b4] ss:$8 sps:$4 sm:$0xff]  }
  0x82   :  { %2233 = vmatprep.subr.bf16.mxu0 %v3178_v63  ;;  %v3259_v63 = vld [vmem:[#allocation2 + $0x5b4] ss:$8 sps:$4 sm:$0xff]  }
  0x84   :  { %2062 = vmatpush1.bf16.msra.mxu1 %v3180_v0  ;;  %v3254_v0 = vld [vmem:[#allocation2 + $0x1b0] ss:$8 sps:$4 sm:$0xff]  }
  0x85   :  { %2234 = vmatpush1.bf16.msra.mxu0 %v3181_v1  ;;  %2063 = vmatprep.subr.bf16.mxu1 %v3182_v2  ;;  %v3257_v1 = vld [vmem:[#allocation2 + $0x5b0] ss:$8 sps:$4 sm:$0xff]   ;;  %v3262_v2 = vld [vmem:[#allocation2 + $0x1c4] ss:$8 sps:$4 sm:$0xff]  }
  0x86   :  { %2235 = vmatprep.subr.bf16.mxu0 %v3184_v3  ;;  %v3265_v3 = vld [vmem:[#allocation2 + $0x5c4] ss:$8 sps:$4 sm:$0xff]  }
  0x88   :  { %2064 = vmatpush1.bf16.msra.mxu1 %v3186_v4  ;;  %v3260_v4 = vld [vmem:[#allocation2 + $0x1c0] ss:$8 sps:$4 sm:$0xff]  }
  0x89   :  { %2236 = vmatpush1.bf16.msra.mxu0 %v3187_v5  ;;  %2076 = vmatprep.subr.bf16.mxu1 %v3190_v7  ;;  %v3263_v5 = vld [vmem:[#allocation2 + $0x5c0] ss:$8 sps:$4 sm:$0xff]   ;;  %v3271_v7 = vld [vmem:[#allocation2 + $0x5d4] ss:$8 sps:$4 sm:$0xff]  }
  0x8a   :  { %2248 = vmatprep.subr.bf16.mxu0 %v3193_v11  ;;  %v3277_v11 = vld [vmem:[#allocation2 + $0x5e4] ss:$8 sps:$4 sm:$0xff]  }
  0x8b   :  { %2066 = vmatmul.mubr.bf16.vlgmr.msra.gmra.mrb[0].mxu1 %v112_v14  ;;  %v3280_v14 = vld [vmem:[#allocation2 + $0x1f4] ss:$8 sps:$4 sm:$0xff]  }
  0x8c   :  { %2238 = vmatmul.mubr.bf16.vlgmr.msra.gmra.mrb[0].mxu0 %v120_v15  ;;  %2077 = vmatpush1.bf16.msra.mxu1 %v3188_v12  ;;  %v3272_v12 = vld [vmem:[#allocation2 + $0x1e0] ss:$8 sps:$4 sm:$0xff]   ;;  %v3283_v15 = vld [vmem:[#allocation2 + $0x5f4] ss:$8 sps:$4 sm:$0xff]  }
  0x8d   :  { %2249 = vmatpush1.bf16.msra.mxu0 %v3191_v13  ;;  %2078 = vmatprep.subr.bf16.mxu1 %v3196_v16  ;;  %v3275_v13 = vld [vmem:[#allocation2 + $0x5e0] ss:$8 sps:$4 sm:$0xff]   ;;  %v3278_v16 = vld [vmem:[#allocation2 + $0x1f0] ss:$8 sps:$4 sm:$0xff]  }
  0x8e   :  { %2250 = vmatprep.subr.bf16.mxu0 %v3199_v17  ;;  %2108 = vmatprep.mubr.bf16.mxu1 %v115_v44  ;;  %v3281_v17 = vld [vmem:[#allocation2 + $0x5f0] ss:$8 sps:$4 sm:$0xff]  }
  0x8f   :  { %2280 = vmatprep.mubr.bf16.mxu0 %v123_v47  ;;  %v3302_v44 = vld [vmem:[#allocation2 + $0x230] ss:$8 sps:$4 sm:$0xff]   ;;  %v3313_v47 = vld [vmem:[#allocation2 + $0x644] ss:$8 sps:$4 sm:$0xff]  }
  0x90   :  { %2079 = vmatpush1.bf16.msra.mxu1 %v3194_v18  ;;  %v74_v18 = vld [vmem:[%s3896_s0 + $0x10] sm:$0xff] }
  0x91   :  { %2251 = vmatpush1.bf16.msra.mxu0 %v3197_v19  ;;  %2080 = vmatprep.subr.bf16.mxu1 %v3202_v20  ;;  %v3286_v19 = vld [vmem:[#allocation2 + $0x204] ss:$8 sps:$4 sm:$0xff]   ;;  %v94_v20 = vld [vmem:[%s3896_s0 + $0xb0] sm:$0xff] }
  0x92   :  { %2252 = vmatprep.subr.bf16.mxu0 %v3205_v21  ;;  %v82_v21 = vld [vmem:[%s3896_s0 + $0x50] sm:$0xff] }
  0x94   :  { %2081 = vmatpush1.bf16.msra.mxu1 %v3200_v22  ;;  %v102_v22 = vld [vmem:[%s3896_s0 + $0xf0] sm:$0xff] }
  0x95   :  { %2253 = vmatpush1.bf16.msra.mxu0 %v3203_v23  ;;  %2082 = vmatprep.subr.bf16.mxu1 %v3208_v24  ;;  %v3289_v23 = vld [vmem:[#allocation2 + $0x604] ss:$8 sps:$4 sm:$0xff]   ;;  %v3284_v24 = vld [vmem:[#allocation2 + $0x200] ss:$8 sps:$4 sm:$0xff]  }
  0x96   :  { %2254 = vmatprep.subr.bf16.mxu0 %v3211_v25  ;;  %v3287_v25 = vld [vmem:[#allocation2 + $0x600] ss:$8 sps:$4 sm:$0xff]  }
  0x98   :  { %2083 = vmatpush1.bf16.msra.mxu1 %v3206_v26  ;;  %v114_v26 = vpack.c.bf16 %v94_v20, %v74_v18  ;;  %v3364_v18 = vld [vmem:[#allocation2 + $0x2d4] ss:$8 sps:$4 sm:$0xff]   ;;  %v3362_v20 = vld [vmem:[#allocation2 + $0x2d0] ss:$8 sps:$4 sm:$0xff]  }
  0x99   :  { %2255 = vmatpush1.bf16.msra.mxu0 %v3209_v27  ;;  %2084 = vmatprep.subr.bf16.mxu1 %v3214_v28  ;;  %v122_v27 = vpack.c.bf16 %v102_v22, %v82_v21  ;;  %v3292_v28 = vld [vmem:[#allocation2 + $0x214] ss:$8 sps:$4 sm:$0xff]   ;;  %v3365_v21 = vld [vmem:[#allocation2 + $0x6d0] ss:$8 sps:$4 sm:$0xff]   ;;  %v3370_v22 = vld [vmem:[#allocation2 + $0x2e4] ss:$8 sps:$4 sm:$0xff]  }
  0x9a   :  { %2256 = vmatprep.subr.bf16.mxu0 %v3217_v29  ;;  %v3295_v29 = vld [vmem:[#allocation2 + $0x614] ss:$8 sps:$4 sm:$0xff]  }
  0x9c   :  { %2085 = vmatpush1.bf16.msra.mxu1 %v3212_v30  ;;  %v3290_v30 = vld [vmem:[#allocation2 + $0x210] ss:$8 sps:$4 sm:$0xff]  }
  0x9d   :  { %2257 = vmatpush1.bf16.msra.mxu0 %v3215_v31  ;;  %2086 = vmatprep.subr.bf16.mxu1 %v3220_v32  ;;  %v3293_v31 = vld [vmem:[#allocation2 + $0x610] ss:$8 sps:$4 sm:$0xff]   ;;  %v3298_v32 = vld [vmem:[#allocation2 + $0x224] ss:$8 sps:$4 sm:$0xff]  }
  0x9e   :  { %2258 = vmatprep.subr.bf16.mxu0 %v3223_v33  ;;  %v3301_v33 = vld [vmem:[#allocation2 + $0x624] ss:$8 sps:$4 sm:$0xff]  }
  0xa0   :  { %2087 = vmatpush1.bf16.msra.mxu1 %v3218_v34  ;;  %v77_v34 = vld [vmem:[%s3896_s0 + $0x28] sm:$0xff] }
  0xa1   :  { %2259 = vmatpush1.bf16.msra.mxu0 %v3221_v35  ;;  %2088 = vmatprep.subr.bf16.mxu1 %v3226_v36  ;;  %v97_v35 = vld [vmem:[%s3896_s0 + $0xc8] sm:$0xff] }
  0xa2   :  { %2260 = vmatprep.subr.bf16.mxu0 %v3229_v37  ;;  %v117_v36 = vpack.c.bf16 %v97_v35, %v77_v34  ;;  %v3296_v37 = vld [vmem:[#allocation2 + $0x220] ss:$8 sps:$4 sm:$0xff]   ;;  %v3385_v35 = vld [vmem:[#allocation2 + $0x704] ss:$8 sps:$4 sm:$0xff]  }
  0xa3   :  { %v104_v34 = vld [vmem:[%s3896_s0 + $0x100] sm:$0xff] }
  0xa4   :  { %2089 = vmatpush1.bf16.msra.mxu1 %v3224_v38  ;;  %v85_v38 = vld [vmem:[%s3896_s0 + $0x68] sm:$0xff] }
  0xa5   :  { %2261 = vmatpush1.bf16.msra.mxu0 %v3227_v39  ;;  %2090 = vmatprep.subr.bf16.mxu1 %v3232_v42  ;;  %v105_v39 = vld [vmem:[%s3896_s0 + $0x108] sm:$0xff]  ;;  %v3304_v42 = vld [vmem:[#allocation2 + $0x234] ss:$8 sps:$4 sm:$0xff]  }
  0xa6   :  { %2262 = vmatprep.subr.bf16.mxu0 %v3235_v43  ;;  %v125_v41 = vpack.c.bf16 %v105_v39, %v85_v38  ;;  %v3307_v43 = vld [vmem:[#allocation2 + $0x634] ss:$8 sps:$4 sm:$0xff]  }
  0xa7   :  { %v79_v38 = vld [vmem:[%s3896_s0 + $0x38] sm:$0xff] }
  0xa8   :  { %2091 = vmatpush1.bf16.msra.mxu1 %v3230_v48  ;;  %v3308_v48 = vld [vmem:[#allocation2 + $0x240] ss:$8 sps:$4 sm:$0xff]   ;;  %v99_v39 = vld [vmem:[%s3896_s0 + $0xd8] sm:$0xff] }
  0xa9   :  { %2263 = vmatpush1.bf16.msra.mxu0 %v3233_v49  ;;  %2092 = vmatprep.subr.bf16.mxu1 %v3238_v50  ;;  %v3311_v49 = vld [vmem:[#allocation2 + $0x640] ss:$8 sps:$4 sm:$0xff]   ;;  %v3316_v50 = vld [vmem:[#allocation2 + $0x254] ss:$8 sps:$4 sm:$0xff]  }
  0xaa   :  { %2264 = vmatprep.subr.bf16.mxu0 %v3241_v51  ;;  %v3319_v51 = vld [vmem:[#allocation2 + $0x654] ss:$8 sps:$4 sm:$0xff]  }
  0xac   :  { %2093 = vmatpush1.bf16.msra.mxu1 %v3236_v52  ;;  %v3314_v52 = vld [vmem:[#allocation2 + $0x250] ss:$8 sps:$4 sm:$0xff]  }
  0xad   :  { %2265 = vmatpush1.bf16.msra.mxu0 %v3239_v53  ;;  %2094 = vmatprep.subr.bf16.mxu1 %v3244_v54  ;;  %v3317_v53 = vld [vmem:[#allocation2 + $0x650] ss:$8 sps:$4 sm:$0xff]   ;;  %v3322_v54 = vld [vmem:[#allocation2 + $0x264] ss:$8 sps:$4 sm:$0xff]  }
  0xae   :  { %2266 = vmatprep.subr.bf16.mxu0 %v3247_v55  ;;  %v3325_v55 = vld [vmem:[#allocation2 + $0x664] ss:$8 sps:$4 sm:$0xff]  }
  0xb0   :  { %2095 = vmatpush1.bf16.msra.mxu1 %v3242_v56  ;;  %v3320_v56 = vld [vmem:[#allocation2 + $0x260] ss:$8 sps:$4 sm:$0xff]  }
  0xb1   :  { %2267 = vmatpush1.bf16.msra.mxu0 %v3245_v57  ;;  %2096 = vmatprep.subr.bf16.mxu1 %v3250_v58  ;;  %v3323_v57 = vld [vmem:[#allocation2 + $0x660] ss:$8 sps:$4 sm:$0xff]   ;;  %v3328_v58 = vld [vmem:[#allocation2 + $0x274] ss:$8 sps:$4 sm:$0xff]  }
  0xb2   :  { %2268 = vmatprep.subr.bf16.mxu0 %v3253_v59  ;;  %v3331_v59 = vld [vmem:[#allocation2 + $0x674] ss:$8 sps:$4 sm:$0xff]  }
  0xb4   :  { %2097 = vmatpush1.bf16.msra.mxu1 %v3248_v60  ;;  %v3326_v60 = vld [vmem:[#allocation2 + $0x270] ss:$8 sps:$4 sm:$0xff]  }
  0xb5   :  { %2269 = vmatpush1.bf16.msra.mxu0 %v3251_v61  ;;  %2098 = vmatprep.subr.bf16.mxu1 %v3256_v62  ;;  %v3329_v61 = vld [vmem:[#allocation2 + $0x670] ss:$8 sps:$4 sm:$0xff]   ;;  %v3334_v62 = vld [vmem:[#allocation2 + $0x284] ss:$8 sps:$4 sm:$0xff]  }
  0xb6   :  { %2270 = vmatprep.subr.bf16.mxu0 %v3259_v63  ;;  %v3337_v63 = vld [vmem:[#allocation2 + $0x684] ss:$8 sps:$4 sm:$0xff]  }
  0xb8   :  { %2099 = vmatpush1.bf16.msra.mxu1 %v3254_v0  ;;  %v3332_v0 = vld [vmem:[#allocation2 + $0x280] ss:$8 sps:$4 sm:$0xff]  }
  0xb9   :  { %2271 = vmatpush1.bf16.msra.mxu0 %v3257_v1  ;;  %2100 = vmatprep.subr.bf16.mxu1 %v3262_v2  ;;  %v3335_v1 = vld [vmem:[#allocation2 + $0x680] ss:$8 sps:$4 sm:$0xff]   ;;  %v3340_v2 = vld [vmem:[#allocation2 + $0x294] ss:$8 sps:$4 sm:$0xff]  }
  0xba   :  { %2272 = vmatprep.subr.bf16.mxu0 %v3265_v3  ;;  %v3343_v3 = vld [vmem:[#allocation2 + $0x694] ss:$8 sps:$4 sm:$0xff]  }
  0xbc   :  { %2101 = vmatpush1.bf16.msra.mxu1 %v3260_v4  ;;  %v3338_v4 = vld [vmem:[#allocation2 + $0x290] ss:$8 sps:$4 sm:$0xff]  }
  0xbd   :  { %2273 = vmatpush1.bf16.msra.mxu0 %v3263_v5  ;;  %2102 = vmatprep.subr.bf16.mxu1 %v3268_v6  ;;  %v3341_v5 = vld [vmem:[#allocation2 + $0x690] ss:$8 sps:$4 sm:$0xff]   ;;  %v3346_v6 = vld [vmem:[#allocation2 + $0x2a4] ss:$8 sps:$4 sm:$0xff]  }
  0xbe   :  { %2274 = vmatprep.subr.bf16.mxu0 %v3271_v7  ;;  %v3349_v7 = vld [vmem:[#allocation2 + $0x6a4] ss:$8 sps:$4 sm:$0xff]  }
  0xc0   :  { %2103 = vmatpush1.bf16.msra.mxu1 %v3266_v8  ;;  %v3344_v8 = vld [vmem:[#allocation2 + $0x2a0] ss:$8 sps:$4 sm:$0xff]  }
  0xc1   :  { %2275 = vmatpush1.bf16.msra.mxu0 %v3269_v9  ;;  %2104 = vmatprep.subr.bf16.mxu1 %v3274_v10  ;;  %v3347_v9 = vld [vmem:[#allocation2 + $0x6a0] ss:$8 sps:$4 sm:$0xff]   ;;  %v3352_v10 = vld [vmem:[#allocation2 + $0x2b4] ss:$8 sps:$4 sm:$0xff]  }
  0xc2   :  { %2276 = vmatprep.subr.bf16.mxu0 %v3277_v11  ;;  %v3355_v11 = vld [vmem:[#allocation2 + $0x6b4] ss:$8 sps:$4 sm:$0xff]  }
  0xc4   :  { %2105 = vmatpush1.bf16.msra.mxu1 %v3272_v12  ;;  %v3350_v12 = vld [vmem:[#allocation2 + $0x2b0] ss:$8 sps:$4 sm:$0xff]  }
  0xc5   :  { %2277 = vmatpush1.bf16.msra.mxu0 %v3275_v13  ;;  %2106 = vmatprep.subr.bf16.mxu1 %v3280_v14  ;;  %v3353_v13 = vld [vmem:[#allocation2 + $0x6b0] ss:$8 sps:$4 sm:$0xff]   ;;  %v3358_v14 = vld [vmem:[#allocation2 + $0x2c4] ss:$8 sps:$4 sm:$0xff]  }
  0xc6   :  { %2278 = vmatprep.subr.bf16.mxu0 %v3283_v15  ;;  %v3361_v15 = vld [vmem:[#allocation2 + $0x6c4] ss:$8 sps:$4 sm:$0xff]  }
  0xc8   :  { %2107 = vmatpush1.bf16.msra.mxu1 %v3278_v16  ;;  %v3356_v16 = vld [vmem:[#allocation2 + $0x2c0] ss:$8 sps:$4 sm:$0xff]  }
  0xc9   :  { %2279 = vmatpush1.bf16.msra.mxu0 %v3281_v17  ;;  %2119 = vmatprep.subr.bf16.mxu1 %v3286_v19  ;;  %v3359_v17 = vld [vmem:[#allocation2 + $0x6c0] ss:$8 sps:$4 sm:$0xff]   ;;  %v3367_v19 = vld [vmem:[#allocation2 + $0x6d4] ss:$8 sps:$4 sm:$0xff]  }
  0xca   :  { %2291 = vmatprep.subr.bf16.mxu0 %v3289_v23  ;;  %v3373_v23 = vld [vmem:[#allocation2 + $0x6e4] ss:$8 sps:$4 sm:$0xff]  }
  0xcb   :  { %2109 = vmatmul.mubr.bf16.vlgmr.msra.gmra.mrb[0].mxu1 %v114_v26  ;;  %v3376_v26 = vld [vmem:[#allocation2 + $0x2f4] ss:$8 sps:$4 sm:$0xff]  }
  0xcc   :  { %2281 = vmatmul.mubr.bf16.vlgmr.msra.gmra.mrb[0].mxu0 %v122_v27  ;;  %2120 = vmatpush1.bf16.msra.mxu1 %v3284_v24  ;;  %v3368_v24 = vld [vmem:[#allocation2 + $0x2e0] ss:$8 sps:$4 sm:$0xff]   ;;  %v3379_v27 = vld [vmem:[#allocation2 + $0x6f4] ss:$8 sps:$4 sm:$0xff]  }
  0xcd   :  { %2292 = vmatpush1.bf16.msra.mxu0 %v3287_v25  ;;  %2121 = vmatprep.subr.bf16.mxu1 %v3292_v28  ;;  %v3371_v25 = vld [vmem:[#allocation2 + $0x6e0] ss:$8 sps:$4 sm:$0xff]   ;;  %v3374_v28 = vld [vmem:[#allocation2 + $0x2f0] ss:$8 sps:$4 sm:$0xff]  }
  0xce   :  { %2293 = vmatprep.subr.bf16.mxu0 %v3295_v29  ;;  %2151 = vmatprep.mubr.bf16.mxu1 %v117_v36  ;;  %v3377_v29 = vld [vmem:[#allocation2 + $0x6f0] ss:$8 sps:$4 sm:$0xff]   ;;  %v3380_v36 = vld [vmem:[#allocation2 + $0x300] ss:$8 sps:$4 sm:$0xff]  }
  0xcf   :  { %2323 = vmatprep.mubr.bf16.mxu0 %v125_v41 }
  0xd0   :  { %2122 = vmatpush1.bf16.msra.mxu1 %v3290_v30  ;;  %v76_v30 = vld [vmem:[%s3896_s0 + $0x20] sm:$0xff] }
  0xd1   :  { %2294 = vmatpush1.bf16.msra.mxu0 %v3293_v31  ;;  %2123 = vmatprep.subr.bf16.mxu1 %v3298_v32  ;;  %v3382_v31 = vld [vmem:[#allocation2 + $0x304] ss:$8 sps:$4 sm:$0xff]  }
  0xd2   :  { %2295 = vmatprep.subr.bf16.mxu0 %v3301_v33  ;;  %v96_v32 = vld [vmem:[%s3896_s0 + $0xc0] sm:$0xff] }
  0xd3   :  { %v84_v33 = vld [vmem:[%s3896_s0 + $0x60] sm:$0xff] }
  0xd4   :  { %2124 = vmatpush1.bf16.msra.mxu1 %v3296_v37  ;;  %v3383_v37 = vld [vmem:[#allocation2 + $0x700] ss:$8 sps:$4 sm:$0xff]   ;;  %v124_v41 = vpack.c.bf16 %v104_v34, %v84_v33  ;;  %v3461_v33 = vld [vmem:[#allocation2 + $0x7d0] ss:$8 sps:$4 sm:$0xff]   ;;  %v3466_v34 = vld [vmem:[#allocation2 + $0x3e4] ss:$8 sps:$4 sm:$0xff]  }
  0xd5   :  { %2296 = vmatpush1.bf16.msra.mxu0 %v3299_v40  ;;  %2125 = vmatprep.subr.bf16.mxu1 %v3304_v42  ;;  %v116_v40 = vpack.c.bf16 %v96_v32, %v76_v30  ;;  %v87_v42 = vld [vmem:[%s3896_s0 + $0x78] sm:$0xff] }
  0xd6   :  { %2297 = vmatprep.subr.bf16.mxu0 %v3307_v43  ;;  %v107_v43 = vld [vmem:[%s3896_s0 + $0x118] sm:$0xff] }
  0xd7   :  { %v3460_v30 = vld [vmem:[#allocation2 + $0x3d4] ss:$8 sps:$4 sm:$0xff]   ;;  %v3458_v32 = vld [vmem:[#allocation2 + $0x3d0] ss:$8 sps:$4 sm:$0xff]  }
  0xd8   :  { %2126 = vmatpush1.bf16.msra.mxu1 %v3302_v44  ;;  %v3388_v44 = vld [vmem:[#allocation2 + $0x314] ss:$8 sps:$4 sm:$0xff]  }
  0xd9   :  { %2298 = vmatpush1.bf16.msra.mxu0 %v3305_v45  ;;  %2127 = vmatprep.subr.bf16.mxu1 %v3310_v46  ;;  %v3391_v45 = vld [vmem:[#allocation2 + $0x714] ss:$8 sps:$4 sm:$0xff]   ;;  %v119_v46 = vpack.c.bf16 %v99_v39, %v79_v38 }
  0xda   :  { %2299 = vmatprep.subr.bf16.mxu0 %v3313_v47  ;;  %v127_v47 = vpack.c.bf16 %v107_v43, %v87_v42  ;;  %v3472_v38 = vld [vmem:[#allocation2 + $0x3f4] ss:$8 sps:$4 sm:$0xff]  }
  0xdb   :  { %v3475_v39 = vld [vmem:[#allocation2 + $0x7f4] ss:$8 sps:$4 sm:$0xff]  }
  0xdc   :  { %2128 = vmatpush1.bf16.msra.mxu1 %v3308_v48  ;;  %v3386_v48 = vld [vmem:[#allocation2 + $0x310] ss:$8 sps:$4 sm:$0xff]  }
  0xdd   :  { %2300 = vmatpush1.bf16.msra.mxu0 %v3311_v49  ;;  %2129 = vmatprep.subr.bf16.mxu1 %v3316_v50  ;;  %v3389_v49 = vld [vmem:[#allocation2 + $0x710] ss:$8 sps:$4 sm:$0xff]   ;;  %v3394_v50 = vld [vmem:[#allocation2 + $0x324] ss:$8 sps:$4 sm:$0xff]  }
  0xde   :  { %2301 = vmatprep.subr.bf16.mxu0 %v3319_v51  ;;  %v3397_v51 = vld [vmem:[#allocation2 + $0x724] ss:$8 sps:$4 sm:$0xff]   ;;  %v78_v42 = vld [vmem:[%s3896_s0 + $0x30] sm:$0xff] }
  0xdf   :  { %v98_v43 = vld [vmem:[%s3896_s0 + $0xd0] sm:$0xff] }
  0xe0   :  { %2130 = vmatpush1.bf16.msra.mxu1 %v3314_v52  ;;  %v3392_v52 = vld [vmem:[#allocation2 + $0x320] ss:$8 sps:$4 sm:$0xff]  }
  0xe1   :  { %2302 = vmatpush1.bf16.msra.mxu0 %v3317_v53  ;;  %2131 = vmatprep.subr.bf16.mxu1 %v3322_v54  ;;  %v3395_v53 = vld [vmem:[#allocation2 + $0x720] ss:$8 sps:$4 sm:$0xff]   ;;  %v3400_v54 = vld [vmem:[#allocation2 + $0x334] ss:$8 sps:$4 sm:$0xff]  }
  0xe2   :  { %2303 = vmatprep.subr.bf16.mxu0 %v3325_v55  ;;  %v3403_v55 = vld [vmem:[#allocation2 + $0x734] ss:$8 sps:$4 sm:$0xff]  }
  0xe4   :  { %2132 = vmatpush1.bf16.msra.mxu1 %v3320_v56  ;;  %v3398_v56 = vld [vmem:[#allocation2 + $0x330] ss:$8 sps:$4 sm:$0xff]  }
  0xe5   :  { %2304 = vmatpush1.bf16.msra.mxu0 %v3323_v57  ;;  %2133 = vmatprep.subr.bf16.mxu1 %v3328_v58  ;;  %v3401_v57 = vld [vmem:[#allocation2 + $0x730] ss:$8 sps:$4 sm:$0xff]   ;;  %v3406_v58 = vld [vmem:[#allocation2 + $0x344] ss:$8 sps:$4 sm:$0xff]  }
  0xe6   :  { %2305 = vmatprep.subr.bf16.mxu0 %v3331_v59  ;;  %v3409_v59 = vld [vmem:[#allocation2 + $0x744] ss:$8 sps:$4 sm:$0xff]  }
  0xe8   :  { %2134 = vmatpush1.bf16.msra.mxu1 %v3326_v60  ;;  %v3404_v60 = vld [vmem:[#allocation2 + $0x340] ss:$8 sps:$4 sm:$0xff]  }
  0xe9   :  { %2306 = vmatpush1.bf16.msra.mxu0 %v3329_v61  ;;  %2135 = vmatprep.subr.bf16.mxu1 %v3334_v62  ;;  %v3407_v61 = vld [vmem:[#allocation2 + $0x740] ss:$8 sps:$4 sm:$0xff]   ;;  %v3412_v62 = vld [vmem:[#allocation2 + $0x354] ss:$8 sps:$4 sm:$0xff]  }
  0xea   :  { %2307 = vmatprep.subr.bf16.mxu0 %v3337_v63  ;;  %v3415_v63 = vld [vmem:[#allocation2 + $0x754] ss:$8 sps:$4 sm:$0xff]  }
  0xec   :  { %2136 = vmatpush1.bf16.msra.mxu1 %v3332_v0  ;;  %v3410_v0 = vld [vmem:[#allocation2 + $0x350] ss:$8 sps:$4 sm:$0xff]  }
  0xed   :  { %2308 = vmatpush1.bf16.msra.mxu0 %v3335_v1  ;;  %2137 = vmatprep.subr.bf16.mxu1 %v3340_v2  ;;  %v3413_v1 = vld [vmem:[#allocation2 + $0x750] ss:$8 sps:$4 sm:$0xff]   ;;  %v3418_v2 = vld [vmem:[#allocation2 + $0x364] ss:$8 sps:$4 sm:$0xff]  }
  0xee   :  { %2309 = vmatprep.subr.bf16.mxu0 %v3343_v3  ;;  %v3421_v3 = vld [vmem:[#allocation2 + $0x764] ss:$8 sps:$4 sm:$0xff]  }
  0xf0   :  { %2138 = vmatpush1.bf16.msra.mxu1 %v3338_v4  ;;  %v3416_v4 = vld [vmem:[#allocation2 + $0x360] ss:$8 sps:$4 sm:$0xff]  }
  0xf1   :  { %2310 = vmatpush1.bf16.msra.mxu0 %v3341_v5  ;;  %2139 = vmatprep.subr.bf16.mxu1 %v3346_v6  ;;  %v3419_v5 = vld [vmem:[#allocation2 + $0x760] ss:$8 sps:$4 sm:$0xff]   ;;  %v3424_v6 = vld [vmem:[#allocation2 + $0x374] ss:$8 sps:$4 sm:$0xff]  }
  0xf2   :  { %2311 = vmatprep.subr.bf16.mxu0 %v3349_v7  ;;  %v3427_v7 = vld [vmem:[#allocation2 + $0x774] ss:$8 sps:$4 sm:$0xff]  }
  0xf4   :  { %2140 = vmatpush1.bf16.msra.mxu1 %v3344_v8  ;;  %v3422_v8 = vld [vmem:[#allocation2 + $0x370] ss:$8 sps:$4 sm:$0xff]  }
  0xf5   :  { %2312 = vmatpush1.bf16.msra.mxu0 %v3347_v9  ;;  %2141 = vmatprep.subr.bf16.mxu1 %v3352_v10  ;;  %v3425_v9 = vld [vmem:[#allocation2 + $0x770] ss:$8 sps:$4 sm:$0xff]   ;;  %v3430_v10 = vld [vmem:[#allocation2 + $0x384] ss:$8 sps:$4 sm:$0xff]  }
  0xf6   :  { %2313 = vmatprep.subr.bf16.mxu0 %v3355_v11  ;;  %v3433_v11 = vld [vmem:[#allocation2 + $0x784] ss:$8 sps:$4 sm:$0xff]  }
  0xf8   :  { %2142 = vmatpush1.bf16.msra.mxu1 %v3350_v12  ;;  %v3428_v12 = vld [vmem:[#allocation2 + $0x380] ss:$8 sps:$4 sm:$0xff]  }
  0xf9   :  { %2314 = vmatpush1.bf16.msra.mxu0 %v3353_v13  ;;  %2143 = vmatprep.subr.bf16.mxu1 %v3358_v14  ;;  %v3431_v13 = vld [vmem:[#allocation2 + $0x780] ss:$8 sps:$4 sm:$0xff]   ;;  %v3436_v14 = vld [vmem:[#allocation2 + $0x394] ss:$8 sps:$4 sm:$0xff]  }
  0xfa   :  { %2315 = vmatprep.subr.bf16.mxu0 %v3361_v15  ;;  %v3439_v15 = vld [vmem:[#allocation2 + $0x794] ss:$8 sps:$4 sm:$0xff]  }
  0xfc   :  { %2144 = vmatpush1.bf16.msra.mxu1 %v3356_v16  ;;  %v3434_v16 = vld [vmem:[#allocation2 + $0x390] ss:$8 sps:$4 sm:$0xff]  }
  0xfd   :  { %2316 = vmatpush1.bf16.msra.mxu0 %v3359_v17  ;;  %2145 = vmatprep.subr.bf16.mxu1 %v3364_v18  ;;  %v3437_v17 = vld [vmem:[#allocation2 + $0x790] ss:$8 sps:$4 sm:$0xff]   ;;  %v3442_v18 = vld [vmem:[#allocation2 + $0x3a4] ss:$8 sps:$4 sm:$0xff]  }
  0xfe   :  { %2317 = vmatprep.subr.bf16.mxu0 %v3367_v19  ;;  %v3445_v19 = vld [vmem:[#allocation2 + $0x7a4] ss:$8 sps:$4 sm:$0xff]  }
 0x100   :  { %2146 = vmatpush1.bf16.msra.mxu1 %v3362_v20  ;;  %v3440_v20 = vld [vmem:[#allocation2 + $0x3a0] ss:$8 sps:$4 sm:$0xff]  }
 0x101   :  { %2318 = vmatpush1.bf16.msra.mxu0 %v3365_v21  ;;  %2147 = vmatprep.subr.bf16.mxu1 %v3370_v22  ;;  %v3443_v21 = vld [vmem:[#allocation2 + $0x7a0] ss:$8 sps:$4 sm:$0xff]   ;;  %v3448_v22 = vld [vmem:[#allocation2 + $0x3b4] ss:$8 sps:$4 sm:$0xff]  }
 0x102   :  { %2319 = vmatprep.subr.bf16.mxu0 %v3373_v23  ;;  %v3451_v23 = vld [vmem:[#allocation2 + $0x7b4] ss:$8 sps:$4 sm:$0xff]  }
 0x104   :  { %2148 = vmatpush1.bf16.msra.mxu1 %v3368_v24  ;;  %v3446_v24 = vld [vmem:[#allocation2 + $0x3b0] ss:$8 sps:$4 sm:$0xff]  }
 0x105   :  { %2320 = vmatpush1.bf16.msra.mxu0 %v3371_v25  ;;  %2149 = vmatprep.subr.bf16.mxu1 %v3376_v26  ;;  %v3449_v25 = vld [vmem:[#allocation2 + $0x7b0] ss:$8 sps:$4 sm:$0xff]   ;;  %v3454_v26 = vld [vmem:[#allocation2 + $0x3c4] ss:$8 sps:$4 sm:$0xff]  }
 0x106   :  { %2321 = vmatprep.subr.bf16.mxu0 %v3379_v27  ;;  %v3457_v27 = vld [vmem:[#allocation2 + $0x7c4] ss:$8 sps:$4 sm:$0xff]  }
 0x108   :  { %2150 = vmatpush1.bf16.msra.mxu1 %v3374_v28  ;;  %v3452_v28 = vld [vmem:[#allocation2 + $0x3c0] ss:$8 sps:$4 sm:$0xff]  }
 0x109   :  { %2322 = vmatpush1.bf16.msra.mxu0 %v3377_v29  ;;  %2162 = vmatprep.subr.bf16.mxu1 %v3382_v31  ;;  %v3455_v29 = vld [vmem:[#allocation2 + $0x7c0] ss:$8 sps:$4 sm:$0xff]   ;;  %v3463_v31 = vld [vmem:[#allocation2 + $0x7d4] ss:$8 sps:$4 sm:$0xff]  }
 0x10a   :  { %2334 = vmatprep.subr.bf16.mxu0 %v3385_v35  ;;  %v3469_v35 = vld [vmem:[#allocation2 + $0x7e4] ss:$8 sps:$4 sm:$0xff]  }
 0x10b   :  { %2152 = vmatmul.mubr.bf16.vlgmr.msra.gmra.mrb[0].mxu1 %v116_v40  ;;  %v3470_v40 = vld [vmem:[#allocation2 + $0x3f0] ss:$8 sps:$4 sm:$0xff]  }
 0x10c   :  { %2324 = vmatmul.mubr.bf16.vlgmr.msra.gmra.mrb[0].mxu0 %v124_v41  ;;  %2163 = vmatpush1.bf16.msra.mxu1 %v3380_v36  ;;  %v3464_v36 = vld [vmem:[#allocation2 + $0x3e0] ss:$8 sps:$4 sm:$0xff]   ;;  %v3473_v41 = vld [vmem:[#allocation2 + $0x7f0] ss:$8 sps:$4 sm:$0xff]  }
 0x10d   :  { %2335 = vmatpush1.bf16.msra.mxu0 %v3383_v37  ;;  %2164 = vmatprep.subr.bf16.mxu1 %v3388_v44  ;;  %v3467_v37 = vld [vmem:[#allocation2 + $0x7e0] ss:$8 sps:$4 sm:$0xff]   ;;  %v86_v44 = vld [vmem:[%s3896_s0 + $0x70] sm:$0xff] }
 0x10e   :  { %2336 = vmatprep.subr.bf16.mxu0 %v3391_v45  ;;  %2194 = vmatprep.mubr.bf16.mxu1 %v119_v46  ;;  %v106_v45 = vld [vmem:[%s3896_s0 + $0x110] sm:$0xff]  ;;  %v3478_v46 = vld [vmem:[#allocation2 + $0x804] ss:$8 sps:$4 sm:$0xff]  }
 0x10f   :  { %2366 = vmatprep.mubr.bf16.mxu0 %v127_v47  ;;  %v3487_v47 = vld [vmem:[#allocation2 + $0x904] ss:$8 sps:$4 sm:$0xff]  }
 0x110   :  { %2165 = vmatpush1.bf16.msra.mxu1 %v3386_v48  ;;  %v91_v48 = vld [vmem:[%s3896_s0 + $0x98] sm:$0xff] }
 0x111   :  { %2337 = vmatpush1.bf16.msra.mxu0 %v3389_v49  ;;  %2166 = vmatprep.subr.bf16.mxu1 %v3394_v50  ;;  %v118_v49 = vpack.c.bf16 %v98_v43, %v78_v42  ;;  %v126_v50 = vpack.c.bf16 %v106_v45, %v86_v44  ;;  %v3542_v42 = vld [vmem:[#allocation2 + $0x8c0] ss:$8 sps:$4 sm:$0xff]   ;;  %v90_v43 = vld [vmem:[%s3896_s0 + $0x90] sm:$0xff] }
 0x112   :  { %2338 = vmatprep.subr.bf16.mxu0 %v3397_v51  ;;  %v111_v51 = vld [vmem:[%s3896_s0 + $0x138] sm:$0xff]  ;;  %v110_v44 = vld [vmem:[%s3896_s0 + $0x130] sm:$0xff] }
 0x113   :  { %v3550_v45 = vld [vmem:[#allocation2 + $0x8d4] ss:$8 sps:$4 sm:$0xff]  }
 0x114   :  { %2167 = vmatpush1.bf16.msra.mxu1 %v3392_v52  ;;  %v89_v52 = vld [vmem:[%s3896_s0 + $0x88] sm:$0xff] }
 0x115   :  { %2339 = vmatpush1.bf16.msra.mxu0 %v3395_v53  ;;  %2168 = vmatprep.subr.bf16.mxu1 %v3400_v54  ;;  %v109_v53 = vld [vmem:[%s3896_s0 + $0x128] sm:$0xff] }
 0x116   :  { %2340 = vmatprep.subr.bf16.mxu0 %v3403_v55  ;;  %v3476_v54 = vld [vmem:[#allocation2 + $0x800] ss:$8 sps:$4 sm:$0xff]  }
 0x117   :  { %v3485_v55 = vld [vmem:[#allocation2 + $0x900] ss:$8 sps:$4 sm:$0xff]  }
 0x118   :  { %2169 = vmatpush1.bf16.msra.mxu1 %v3398_v56  ;;  %v3481_v56 = vld [vmem:[#allocation2 + $0x814] ss:$8 sps:$4 sm:$0xff]  }
 0x119   :  { %2341 = vmatpush1.bf16.msra.mxu0 %v3401_v57  ;;  %2170 = vmatprep.subr.bf16.mxu1 %v3406_v58  ;;  %v3493_v57 = vld [vmem:[#allocation2 + $0x914] ss:$8 sps:$4 sm:$0xff]   ;;  %v131_v58 = vpack.c.bf16 %v111_v51, %v91_v48  ;;  %v3548_v48 = vld [vmem:[#allocation2 + $0x8d0] ss:$8 sps:$4 sm:$0xff]  }
 0x11a   :  { %2342 = vmatprep.subr.bf16.mxu0 %v3409_v59  ;;  %v129_v59 = vpack.c.bf16 %v109_v53, %v89_v52  ;;  %v3560_v51 = vld [vmem:[#allocation2 + $0x8f4] ss:$8 sps:$4 sm:$0xff]   ;;  %v3558_v52 = vld [vmem:[#allocation2 + $0x8f0] ss:$8 sps:$4 sm:$0xff]   ;;  %v88_v53 = vld [vmem:[%s3896_s0 + $0x80] sm:$0xff] }
 0x11c   :  { %2171 = vmatpush1.bf16.msra.mxu1 %v3404_v60  ;;  %v3479_v60 = vld [vmem:[#allocation2 + $0x810] ss:$8 sps:$4 sm:$0xff]  }
 0x11d   :  { %2343 = vmatpush1.bf16.msra.mxu0 %v3407_v61  ;;  %2172 = vmatprep.subr.bf16.mxu1 %v3412_v62  ;;  %v3491_v61 = vld [vmem:[#allocation2 + $0x910] ss:$8 sps:$4 sm:$0xff]   ;;  %v3484_v62 = vld [vmem:[#allocation2 + $0x824] ss:$8 sps:$4 sm:$0xff]  }
 0x11e   :  { %2344 = vmatprep.subr.bf16.mxu0 %v3415_v63  ;;  %v3499_v63 = vld [vmem:[#allocation2 + $0x924] ss:$8 sps:$4 sm:$0xff]  }
 0x120   :  { %2173 = vmatpush1.bf16.msra.mxu1 %v3410_v0  ;;  %v3482_v0 = vld [vmem:[#allocation2 + $0x820] ss:$8 sps:$4 sm:$0xff]  }
 0x121   :  { %2345 = vmatpush1.bf16.msra.mxu0 %v3413_v1  ;;  %2174 = vmatprep.subr.bf16.mxu1 %v3418_v2  ;;  %v3497_v1 = vld [vmem:[#allocation2 + $0x920] ss:$8 sps:$4 sm:$0xff]   ;;  %v3490_v2 = vld [vmem:[#allocation2 + $0x834] ss:$8 sps:$4 sm:$0xff]  }
 0x122   :  { %2346 = vmatprep.subr.bf16.mxu0 %v3421_v3  ;;  %v3505_v3 = vld [vmem:[#allocation2 + $0x934] ss:$8 sps:$4 sm:$0xff]  }
 0x124   :  { %2175 = vmatpush1.bf16.msra.mxu1 %v3416_v4  ;;  %v3488_v4 = vld [vmem:[#allocation2 + $0x830] ss:$8 sps:$4 sm:$0xff]  }
 0x125   :  { %2347 = vmatpush1.bf16.msra.mxu0 %v3419_v5  ;;  %2176 = vmatprep.subr.bf16.mxu1 %v3424_v6  ;;  %v3503_v5 = vld [vmem:[#allocation2 + $0x930] ss:$8 sps:$4 sm:$0xff]   ;;  %v3496_v6 = vld [vmem:[#allocation2 + $0x844] ss:$8 sps:$4 sm:$0xff]  }
 0x126   :  { %2348 = vmatprep.subr.bf16.mxu0 %v3427_v7  ;;  %v3511_v7 = vld [vmem:[#allocation2 + $0x944] ss:$8 sps:$4 sm:$0xff]  }
 0x128   :  { %2177 = vmatpush1.bf16.msra.mxu1 %v3422_v8  ;;  %v3494_v8 = vld [vmem:[#allocation2 + $0x840] ss:$8 sps:$4 sm:$0xff]  }
 0x129   :  { %2349 = vmatpush1.bf16.msra.mxu0 %v3425_v9  ;;  %2178 = vmatprep.subr.bf16.mxu1 %v3430_v10  ;;  %v3509_v9 = vld [vmem:[#allocation2 + $0x940] ss:$8 sps:$4 sm:$0xff]   ;;  %v3502_v10 = vld [vmem:[#allocation2 + $0x854] ss:$8 sps:$4 sm:$0xff]  }
 0x12a   :  { %2350 = vmatprep.subr.bf16.mxu0 %v3433_v11  ;;  %v3517_v11 = vld [vmem:[#allocation2 + $0x954] ss:$8 sps:$4 sm:$0xff]  }
 0x12c   :  { %2179 = vmatpush1.bf16.msra.mxu1 %v3428_v12  ;;  %v3500_v12 = vld [vmem:[#allocation2 + $0x850] ss:$8 sps:$4 sm:$0xff]  }
 0x12d   :  { %2351 = vmatpush1.bf16.msra.mxu0 %v3431_v13  ;;  %2180 = vmatprep.subr.bf16.mxu1 %v3436_v14  ;;  %v3515_v13 = vld [vmem:[#allocation2 + $0x950] ss:$8 sps:$4 sm:$0xff]   ;;  %v3508_v14 = vld [vmem:[#allocation2 + $0x864] ss:$8 sps:$4 sm:$0xff]  }
 0x12e   :  { %2352 = vmatprep.subr.bf16.mxu0 %v3439_v15  ;;  %v3523_v15 = vld [vmem:[#allocation2 + $0x964] ss:$8 sps:$4 sm:$0xff]  }
 0x130   :  { %2181 = vmatpush1.bf16.msra.mxu1 %v3434_v16  ;;  %v3506_v16 = vld [vmem:[#allocation2 + $0x860] ss:$8 sps:$4 sm:$0xff]  }
 0x131   :  { %2353 = vmatpush1.bf16.msra.mxu0 %v3437_v17  ;;  %2182 = vmatprep.subr.bf16.mxu1 %v3442_v18  ;;  %v3521_v17 = vld [vmem:[#allocation2 + $0x960] ss:$8 sps:$4 sm:$0xff]   ;;  %v3514_v18 = vld [vmem:[#allocation2 + $0x874] ss:$8 sps:$4 sm:$0xff]  }
 0x132   :  { %2354 = vmatprep.subr.bf16.mxu0 %v3445_v19  ;;  %v3529_v19 = vld [vmem:[#allocation2 + $0x974] ss:$8 sps:$4 sm:$0xff]  }
 0x134   :  { %2183 = vmatpush1.bf16.msra.mxu1 %v3440_v20  ;;  %v3512_v20 = vld [vmem:[#allocation2 + $0x870] ss:$8 sps:$4 sm:$0xff]  }
 0x135   :  { %2355 = vmatpush1.bf16.msra.mxu0 %v3443_v21  ;;  %2184 = vmatprep.subr.bf16.mxu1 %v3448_v22  ;;  %v3527_v21 = vld [vmem:[#allocation2 + $0x970] ss:$8 sps:$4 sm:$0xff]   ;;  %v3520_v22 = vld [vmem:[#allocation2 + $0x884] ss:$8 sps:$4 sm:$0xff]  }
 0x136   :  { %2356 = vmatprep.subr.bf16.mxu0 %v3451_v23  ;;  %v3535_v23 = vld [vmem:[#allocation2 + $0x984] ss:$8 sps:$4 sm:$0xff]  }
 0x138   :  { %2185 = vmatpush1.bf16.msra.mxu1 %v3446_v24  ;;  %v3518_v24 = vld [vmem:[#allocation2 + $0x880] ss:$8 sps:$4 sm:$0xff]  }
 0x139   :  { %2357 = vmatpush1.bf16.msra.mxu0 %v3449_v25  ;;  %2186 = vmatprep.subr.bf16.mxu1 %v3454_v26  ;;  %v3533_v25 = vld [vmem:[#allocation2 + $0x980] ss:$8 sps:$4 sm:$0xff]   ;;  %v3526_v26 = vld [vmem:[#allocation2 + $0x894] ss:$8 sps:$4 sm:$0xff]  }
 0x13a   :  { %2358 = vmatprep.subr.bf16.mxu0 %v3457_v27  ;;  %v3541_v27 = vld [vmem:[#allocation2 + $0x994] ss:$8 sps:$4 sm:$0xff]  }
 0x13c   :  { %2187 = vmatpush1.bf16.msra.mxu1 %v3452_v28  ;;  %v3524_v28 = vld [vmem:[#allocation2 + $0x890] ss:$8 sps:$4 sm:$0xff]  }
 0x13d   :  { %2359 = vmatpush1.bf16.msra.mxu0 %v3455_v29  ;;  %2188 = vmatprep.subr.bf16.mxu1 %v3460_v30  ;;  %v3539_v29 = vld [vmem:[#allocation2 + $0x990] ss:$8 sps:$4 sm:$0xff]   ;;  %v3532_v30 = vld [vmem:[#allocation2 + $0x8a4] ss:$8 sps:$4 sm:$0xff]  }
 0x13e   :  { %2360 = vmatprep.subr.bf16.mxu0 %v3463_v31  ;;  %v3547_v31 = vld [vmem:[#allocation2 + $0x9a4] ss:$8 sps:$4 sm:$0xff]  }
 0x140   :  { %2189 = vmatpush1.bf16.msra.mxu1 %v3458_v32  ;;  %v3530_v32 = vld [vmem:[#allocation2 + $0x8a0] ss:$8 sps:$4 sm:$0xff]  }
 0x141   :  { %2361 = vmatpush1.bf16.msra.mxu0 %v3461_v33  ;;  %2190 = vmatprep.subr.bf16.mxu1 %v3466_v34  ;;  %v3545_v33 = vld [vmem:[#allocation2 + $0x9a0] ss:$8 sps:$4 sm:$0xff]   ;;  %v3538_v34 = vld [vmem:[#allocation2 + $0x8b4] ss:$8 sps:$4 sm:$0xff]  }
 0x142   :  { %2362 = vmatprep.subr.bf16.mxu0 %v3469_v35  ;;  %v3553_v35 = vld [vmem:[#allocation2 + $0x9b4] ss:$8 sps:$4 sm:$0xff]  }
 0x144   :  { %2191 = vmatpush1.bf16.msra.mxu1 %v3464_v36  ;;  %v444_v36 = vld [vmem:[#allocation2 + $0x9c0] sm:$0x33] }
 0x145   :  { %2363 = vmatpush1.bf16.msra.mxu0 %v3467_v37  ;;  %2192 = vmatprep.subr.bf16.mxu1 %v3472_v38  ;;  %v3536_v37 = vld [vmem:[#allocation2 + $0x8b0] ss:$8 sps:$4 sm:$0xff]  }
 0x146   :  { %2364 = vmatprep.subr.bf16.mxu0 %v3475_v39  ;;  %v3551_v38 = vld [vmem:[#allocation2 + $0x9b0] ss:$8 sps:$4 sm:$0xff]   ;;  %v3544_v39 = vld [vmem:[#allocation2 + $0x8c4] ss:$8 sps:$4 sm:$0xff]  }
 0x148   :  { %2193 = vmatpush1.bf16.msra.mxu1 %v3470_v40  ;;  %v2993_v40 = vcombine.high %v444_v36, %v444_v36 }
 0x149   :  { %2365 = vmatpush1.bf16.msra.mxu0 %v3473_v41  ;;  %2420 = vmatprep.subr.bf16.mxu1 %v3487_v47  ;;  %v2992_v41 = vcombine.low %v444_v36, %v444_v36  ;;  %v130_v47 = vpack.c.bf16 %v110_v44, %v90_v43 }
 0x14a   :  { %2377 = vmatprep.subr.bf16.mxu0 %v3478_v46 }
 0x14b   :  { %2195 = vmatmul.mubr.bf16.vlgmr.msra.gmra.mrb[0].mxu1 %v118_v49  ;;  %v2028_v46 = vsel %vm2026_vm1, %v2992_v41, 0  ;;  %v3556_v49 = vld [vmem:[#allocation2 + $0x8e4] ss:$8 sps:$4 sm:$0xff]  }
 0x14c   :  { %2367 = vmatmul.mubr.bf16.vlgmr.msra.gmra.mrb[0].mxu0 %v126_v50  ;;  %2421 = vmatpush1.bf16.msra.mxu1 %v3485_v55  ;;  %v3554_v50 = vld [vmem:[#allocation2 + $0x8e0] ss:$8 sps:$4 sm:$0xff]  }
 0x14d   :  { %2378 = vmatpush1.bf16.msra.mxu0 %v3476_v54  ;;  %2422 = vmatprep.subr.bf16.mxu1 %v3493_v57  ;;  %v108_v54 = vld [vmem:[%s3896_s0 + $0x120] sm:$0xff]  ;;  %v3563_v57 = vld [vmem:[#allocation6] sm:$0xff]  }
 0x14e   :  { %2379 = vmatprep.subr.bf16.mxu0 %v3481_v56  ;;  %2995 = vmatprep.mubr.msk.bf16.mxu1 %vm2022_vm0, %v131_v58  ;;  %v128_v55 = vpack.c.bf16 %v108_v54, %v88_v53  ;;  %v3562_v56 = vld [vmem:[#allocation6 + $0x40] sm:$0xff]   ;;  %v3564_v58 = vld [vmem:[#allocation6 + $0x48] sm:$0xff]  }
 0x14f   :  { %2409 = vmatprep.mubr.bf16.mxu0 %v129_v59  ;;  %v3565_v59 = vld [vmem:[#allocation6 + $0x8] sm:$0xff]  }
 0x150   :  { %2423 = vmatpush1.bf16.msra.mxu1 %v3491_v61  ;;  %v3567_v61 = vld [vmem:[#allocation6 + $0x10] sm:$0xff]  }
 0x151   :  { %2380 = vmatpush1.bf16.msra.mxu0 %v3479_v60  ;;  %2424 = vmatprep.subr.bf16.mxu1 %v3499_v63  ;;  %v3566_v60 = vld [vmem:[#allocation6 + $0x50] sm:$0xff]   ;;  %v3569_v63 = vld [vmem:[#allocation6 + $0x18] sm:$0xff]  }
 0x152   :  { %2381 = vmatprep.subr.bf16.mxu0 %v3484_v62  ;;  %v3568_v62 = vld [vmem:[#allocation6 + $0x58] sm:$0xff]  }
 0x154   :  { %2425 = vmatpush1.bf16.msra.mxu1 %v3497_v1  ;;  %v3571_v1 = vld [vmem:[#allocation6 + $0x20] sm:$0xff]  }
 0x155   :  { %2382 = vmatpush1.bf16.msra.mxu0 %v3482_v0  ;;  %2426 = vmatprep.subr.bf16.mxu1 %v3505_v3  ;;  %v3570_v0 = vld [vmem:[#allocation6 + $0x60] sm:$0xff]   ;;  %v3573_v3 = vld [vmem:[#allocation6 + $0x28] sm:$0xff]  }
 0x156   :  { %2383 = vmatprep.subr.bf16.mxu0 %v3490_v2  ;;  %v3572_v2 = vld [vmem:[#allocation6 + $0x68] sm:$0xff]  }
 0x158   :  { %2427 = vmatpush1.bf16.msra.mxu1 %v3503_v5  ;;  %v3575_v5 = vld [vmem:[#allocation6 + $0x30] sm:$0xff]  }
 0x159   :  { %2384 = vmatpush1.bf16.msra.mxu0 %v3488_v4  ;;  %2428 = vmatprep.subr.bf16.mxu1 %v3511_v7  ;;  %v3574_v4 = vld [vmem:[#allocation6 + $0x70] sm:$0xff]   ;;  %v3577_v7 = vld [vmem:[#allocation6 + $0x38] sm:$0xff]  }
 0x15a   :  { %2385 = vmatprep.subr.bf16.mxu0 %v3496_v6  ;;  %v3576_v6 = vld [vmem:[#allocation6 + $0x78] sm:$0xff]  }
 0x15c   :  { %2429 = vmatpush1.bf16.msra.mxu1 %v3509_v9 }
 0x15d   :  { %2386 = vmatpush1.bf16.msra.mxu0 %v3494_v8  ;;  %2430 = vmatprep.subr.bf16.mxu1 %v3517_v11 }
 0x15e   :  { %2387 = vmatprep.subr.bf16.mxu0 %v3502_v10 }
 0x160   :  { %2431 = vmatpush1.bf16.msra.mxu1 %v3515_v13 }
 0x161   :  { %2388 = vmatpush1.bf16.msra.mxu0 %v3500_v12  ;;  %2432 = vmatprep.subr.bf16.mxu1 %v3523_v15  ;;  %v447_v12 = vlaneseq }
 0x162   :  { %2389 = vmatprep.subr.bf16.mxu0 %v3508_v14 }
 0x163   :  { %v448_v13 = vshrl.u32 %v447_v12, 7 }
 0x164   :  { %2433 = vmatpush1.bf16.msra.mxu1 %v3521_v17 }
 0x165   :  { %2390 = vmatpush1.bf16.msra.mxu0 %v3506_v16  ;;  %2434 = vmatprep.subr.bf16.mxu1 %v3529_v19  ;;  %v449_v17 = vsub.s32 0, %v448_v13  ;;  %v445_v19 = vld [vmem:[#allocation4] sm:$0x3] }
 0x166   :  { %2391 = vmatprep.subr.bf16.mxu0 %v3514_v18 }
 0x168   :  { %2435 = vmatpush1.bf16.msra.mxu1 %v3527_v21  ;;  %v450_v21 = vrot.slane %v445_v19, %v449_v17 }
 0x169   :  { %2392 = vmatpush1.bf16.msra.mxu0 %v3512_v20  ;;  %2436 = vmatprep.subr.bf16.mxu1 %v3535_v23  ;;  %v453_v20 = vsub.s32 1, %v448_v13 }
 0x16a   :  { %2393 = vmatprep.subr.bf16.mxu0 %v3520_v22 }
 0x16b   :  { %v454_v22 = vrot.slane %v445_v19, %v453_v20 }
 0x16c   :  { %2437 = vmatpush1.bf16.msra.mxu1 %v3533_v25 }
 0x16d   :  { %2394 = vmatpush1.bf16.msra.mxu0 %v3518_v24  ;;  %2438 = vmatprep.subr.bf16.mxu1 %v3541_v27 }
 0x16e   :  { %2395 = vmatprep.subr.bf16.mxu0 %v3526_v26 }
 0x170   :  { %2439 = vmatpush1.bf16.msra.mxu1 %v3539_v29 }
 0x171   :  { %2396 = vmatpush1.bf16.msra.mxu0 %v3524_v28  ;;  %2440 = vmatprep.subr.bf16.mxu1 %v3547_v31 }
 0x172   :  { %2397 = vmatprep.subr.bf16.mxu0 %v3532_v30 }
 0x174   :  { %2441 = vmatpush1.bf16.msra.mxu1 %v3545_v33 }
 0x175   :  { %2398 = vmatpush1.bf16.msra.mxu0 %v3530_v32  ;;  %2442 = vmatprep.subr.bf16.mxu1 %v3553_v35 }
 0x176   :  { %2399 = vmatprep.subr.bf16.mxu0 %v3538_v34 }
 0x178   :  { %2443 = vmatpush1.bf16.msra.mxu1 %v3551_v38 }
 0x179   :  { %2400 = vmatpush1.bf16.msra.mxu0 %v3536_v37  ;;  %2994 = vmatprep.subr.msk.bf16.mxu1 %vm2026_vm1, %v2993_v40 }
 0x17a   :  { %2401 = vmatprep.subr.bf16.mxu0 %v3544_v39 }
 0x17c   :  { %2445 = vmatpush1.bf16.msra.mxu1 %v2028_v46 }
 0x17d   :  { %2402 = vmatpush1.bf16.msra.mxu0 %v3542_v42  ;;  %3022 = vmatprep.subr.bf16.mxu1 %v3562_v56 }
 0x17e   :  { %2403 = vmatprep.subr.bf16.mxu0 %v3550_v45 }
 0x17f   :  { %2453 = vmatmul.mubr.bf16.vlgmr.msra.gmra.mrb[4].mxu1 %v130_v47  ;;  %v2996_v47 = vld [vmem:[#allocation7] ss:$0 sm:$0xff] }
 0x180   :  { %3023 = vmatpush3.bf16.msra.mxu1 %v3563_v57 }
 0x181   :  { %2404 = vmatpush1.bf16.msra.mxu0 %v3548_v48  ;;  %3024 = vmatprep.subr.bf16.mxu1 %v3564_v58 }
 0x182   :  { %2405 = vmatprep.subr.bf16.mxu0 %v3556_v49 }
 0x184   :  { %3025 = vmatpush3.bf16.msra.mxu1 %v3565_v59 }
 0x185   :  { %2406 = vmatpush1.bf16.msra.mxu0 %v3554_v50  ;;  %3026 = vmatprep.subr.bf16.mxu1 %v3566_v60 }
 0x186   :  { %2407 = vmatprep.subr.bf16.mxu0 %v3560_v51 }
 0x188   :  { %3027 = vmatpush3.bf16.msra.mxu1 %v3567_v61 }
 0x189   :  { %2408 = vmatpush1.bf16.msra.mxu0 %v3558_v52  ;;  %3028 = vmatprep.subr.bf16.mxu1 %v3568_v62 }
 0x18c   :  { %2410 = vmatmul.mubr.bf16.vlgmr.msra.gmra.mrb[0].mxu0 %v128_v55  ;;  %3029 = vmatpush3.bf16.msra.mxu1 %v3569_v63 }
 0x18d   :  { %3030 = vmatprep.subr.bf16.mxu1 %v3570_v0 }
 0x190   :  { %3031 = vmatpush3.bf16.msra.mxu1 %v3571_v1 }
 0x191   :  { %3032 = vmatprep.subr.bf16.mxu1 %v3572_v2 }
 0x194   :  { %3033 = vmatpush3.bf16.msra.mxu1 %v3573_v3 }
 0x195   :  { %3034 = vmatprep.subr.bf16.mxu1 %v3574_v4 }
 0x198   :  { %3035 = vmatpush3.bf16.msra.mxu1 %v3575_v5 }
 0x199   :  { %3036 = vmatprep.subr.bf16.mxu1 %v3576_v6 }
 0x19c   :  { %3037 = vmatpush3.bf16.msra.mxu1 %v3577_v7 }
 0x21e   :  { %v2196_v8 = vpop.f32.mrb[0].mxu1 }
 0x21f   :  { %v2198_v9 = vpop.f32.mrb[1].mxu1  ;;  %v3044_v23 = vadd.f32 %v2196_v8, %v450_v21 }
 0x220   :  { %v2200_v10 = vpop.f32.mrb[2].mxu1  ;;  %v3047_v24 = vadd.f32 %v2198_v9, %v454_v22 }
 0x221   :  { %v2202_v11 = vpop.f32.mrb[3].mxu1  ;;  %v3050_v26 = vadd.f32 %v2200_v10, %v450_v21 }
 0x222   :  { %v3053_v29 = vadd.f32 %v2202_v11, %v454_v22 }
 0x252   :  { %v2454_v14 = vpop.f32.mrb[4].mxu1 }
 0x253   :  { %v2456_v15 = vpop.f32.mrb[5].mxu1 }
 0x254   :  { %v2458_v16 = vpop.f32.mrb[6].mxu1 }
 0x255   :  { %v2460_v18 = vpop.f32.mrb[7].mxu1 }
 0x25f   :  { %v2411_v25 = vpop.f32.mrb[0].mxu0 }
 0x260   :  { %v3045_v27 = vadd.f32 %v3044_v23, %v2411_v25  ;;  %v2413_v28 = vpop.f32.mrb[1].mxu0 }
 0x261   :  { %v3048_v30 = vadd.f32 %v3047_v24, %v2413_v28  ;;  %v2415_v31 = vpop.f32.mrb[2].mxu0 }
 0x262   :  { %v3046_v32 = vadd.f32 %v3045_v27, %v2454_v14  ;;  %v3051_v33 = vadd.f32 %v3050_v26, %v2415_v31  ;;  %v2417_v34 = vpop.f32.mrb[3].mxu0 }
 0x263   :  { %v3049_v35 = vadd.f32 %v3048_v30, %v2456_v15  ;;  %v3054_v36 = vadd.f32 %v3053_v29, %v2417_v34 }
 0x264   :  { %v3052_v37 = vadd.f32 %v3051_v33, %v2458_v16  ;;  %v2463_v39 = vmax.f32 %v3046_v32, 0.0 }
 0x265   :  { %v3055_v38 = vadd.f32 %v3054_v36, %v2460_v18  ;;  %v2464_v41 = vmax.f32 %v3049_v35, 0.0 }
 0x266   :  { %v2465_v40 = vmax.f32 %v3052_v37, 0.0 }
 0x267   :  { %v2466_v42 = vmax.f32 %v3055_v38, 0.0 }
 0x268   :  { %v2467_v43 = vpack.c.bf16 %v2465_v40, %v2463_v39 }
 0x269   :  { %v2468_v44 = vpack.c.bf16 %v2466_v42, %v2464_v41 }
 0x26b   :  { %2636 = vmatprep.mubr.bf16.mxu1 %v2468_v44 }
 0x26c   :  { %2637 = vmatmul.mubr.bf16.vlgmr.msra.gmra.mrb[8].mxu1 %v2467_v43 }
 0x33f   :  { %v3038_v45 = vpop.f32.mrb[8].mxu1 }
 0x340   :  { %v3039_v46 = vpop.f32.mrb[9].mxu1 }
 0x341   :  { %v3040_v48 = vadd.f32 %v3039_v46, %v3038_v45  ;;  %v3041_v49 = vpop.f32.mrb[10].mxu1 }
 0x342   :  { %v3042_v50 = vpop.f32.mrb[11].mxu1 }
 0x343   :  { %v3043_v51 = vadd.f32 %v3042_v50, %v3041_v49  ;;  %v2639_v52 = vadd.f32 %v3040_v48, %v2996_v47 }
 0x345   :  { %2645 = vmax.xlane.f32.xlu0 %v2639_v52  ;;  %v2642_v53 = vadd.f32 %v3043_v51, %v2996_v47 }
 0x349   :  { %2647 = vmax.xlane.f32.xlu0 %v2642_v53 }
 0x3d2   :  { %v2646_v54 = vpop.xlane.xlu0 %2645 }
 0x3d3   :  { %v2649_v55 = vsub.f32 %v2639_v52, %v2646_v54 }
 0x3d5   :  { %v2651_v56 = vmul.f32 1.442695, %v2649_v55 }
 0x3d6   :  { %v2648_v57 = vpop.xlane.xlu0 %2647 }
 0x3d7   :  { %3578 = vpow2.f32 %v2651_v56  ;;  %v2650_v58 = vsub.f32 %v2642_v53, %v2648_v57 }
 0x3d9   :  { %v2653_v59 = vmul.f32 1.442695, %v2650_v58 }
 0x3db   :  { %3580 = vpow2.f32 %v2653_v59 }
 0x3e1   :  { %v3579_v60 = vpop.eup %3578 }
 0x3e2   :  { %2655 = vadd.xlane.f32.xlu1 %v3579_v60 }
 0x3e5   :  { %v3581_v61 = vpop.eup %3580 }
 0x3e6   :  { %2657 = vadd.xlane.f32.xlu1 %v3581_v61 }
 0x46f   :  { %v2656_v62 = vpop.xlane.xlu1 %2655 }
 0x470   :  { %3582 = vrcp.f32 %v2656_v62 }
 0x473   :  { %v2658_v63 = vpop.xlane.xlu1 %2657 }
 0x474   :  { %3584 = vrcp.f32 %v2658_v63 }
 0x47a   :  { %v3583_v0 = vpop.eup %3582 }
 0x47b   :  { %v2660_v2 = vmul.f32 %v3583_v0, %v3579_v60 }
 0x47e   :  { %v3585_v1 = vpop.eup %3584 }
 0x47f   :  { %v2662_v3 = vmul.f32 %v3585_v1, %v3581_v61 }
 0x481   :  { %v3020_v4 = vpack.c.bf16 %v2662_v3, %v2660_v2 }
 0x483   :  { %3021 = vst [vmem:[%s3901_s5] sm:$0xff] %v3020_v4  }
 0x484   :  { %2677 = vsyncpa [#allocation3], 1 }
 0x485   :  { %2678 = vsyncpa [#allocation5], 1 }
 0x486   :  { %2679 = vsyncpa [#allocation8], 1 }

</bundles_post_ra>
